<compile_context>
chip_gen: v5e
topology: v5e:2x2
jax: 0.10.0
libtpu: 0.0.40
codegen_flags: <defaults>
</compile_context>

<pallas_src>
import functools
import math

import jax
import jax.numpy as jnp
from jax.experimental import pallas as pl
from jax.experimental.pallas import tpu as pltpu

ICM_EMBED_DIM = 256
HIDDEN = 512
LEAKY_SLOPE = 0.01  # PyTorch nn.LeakyReLU default
LANE = 128


def _round_up(x, m):
    return (x + m - 1) // m * m


def icm_kernel(feat_ref, nfeat_ref, act_ref,
               enc_w_ref, enc_b_ref,
               inv_w1a_ref, inv_w1b_ref, inv_b1_ref, inv_w2_ref, inv_b2_ref,
               fwd_w1a_ref, fwd_w1b_ref, fwd_b1_ref, fwd_w2_ref, fwd_b2_ref,
               pred_act_ref, pred_next_ref, next_feat_ref):
    f32 = jnp.float32
    cdt = enc_w_ref.dtype          # matmul operand dtype (bf16 default, or f32)
    tile_b = feat_ref.shape[0]
    n_actions = fwd_w1b_ref.shape[0]

    # ---- encoder: two dots against the shared resident enc_w (no in-kernel
    # axis-0 concat copy; with tile_b>=256 each dot already fills the MXU) ----
    phi = jnp.maximum(
        jnp.dot(feat_ref[...], enc_w_ref[...], preferred_element_type=f32)
        + enc_b_ref[...], 0.0)
    phi_n = jnp.maximum(
        jnp.dot(nfeat_ref[...], enc_w_ref[...], preferred_element_type=f32)
        + enc_b_ref[...], 0.0)
    phi_c = phi.astype(cdt)
    phi_n_c = phi_n.astype(cdt)

    # ---- inverse model: cat([phi, phi_n], 1) -> Linear -> LeakyReLU -> Linear ----
    h = (jnp.dot(phi_c, inv_w1a_ref[...], preferred_element_type=f32)
         + jnp.dot(phi_n_c, inv_w1b_ref[...], preferred_element_type=f32)
         + inv_b1_ref[...])
    h = jnp.where(h > 0, h, LEAKY_SLOPE * h)
    # inv_w2 / inv_b2 are padded to a full 128-lane output -> unmasked store.
    pred_act_ref[...] = (jnp.dot(h.astype(cdt), inv_w2_ref[...],
                                 preferred_element_type=f32) + inv_b2_ref[...])

    # ---- forward model first-layer action term ----
    # one_hot(actions) @ fwd_w1b is replaced by n_actions VPU selects of the
    # corresponding fwd_w1b row (VPU has slack in this MXU-bound kernel).
    act = act_ref[...]                                  # (tile_b, 1) int32
    w1b = fwd_w1b_ref[...].astype(f32)                  # (n_actions, HIDDEN), tiny
    act_contrib = jnp.zeros((tile_b, w1b.shape[1]), f32)
    for a in range(n_actions):                          # tiny static unroll
        act_contrib = act_contrib + jnp.where(act == a, w1b[a:a + 1, :], 0.0)

    # ---- forward model: cat([phi, onehot], 1) -> Linear -> LeakyReLU -> Linear ----
    g = (jnp.dot(phi_c, fwd_w1a_ref[...], preferred_element_type=f32)
         + act_contrib + fwd_b1_ref[...])
    g = jnp.where(g > 0, g, LEAKY_SLOPE * g)
    pred_next_ref[...] = (jnp.dot(g.astype(cdt), fwd_w2_ref[...],
                                  preferred_element_type=f32) + fwd_b2_ref[...])

    next_feat_ref[...] = phi_n


def icm_forward(features, next_features, actions, params, *,
                tile_b=256, compute_dtype=jnp.bfloat16):
    """Pallas ICM forward. Returns (pred_action, pred_next_feature, next_feature)."""
    B, fdim = features.shape
    n_actions = params["inv_w2"].shape[-1]
    n_act_pad = _round_up(n_actions, LANE)

    # Batch tile: multiple of 8 sublanes, no larger than the (rounded) batch,
    # and — when B allows — small enough that the grid has >= 2 steps so both
    # v7x TensorCores get work ("parallel" axis; no effect on v5e/v6e).
    b8 = _round_up(B, 8)
    tile_b = max(8, min(_round_up(tile_b, 8), b8))
    if b8 >= 16:
        tile_b = min(tile_b, (b8 // 2) // 8 * 8)
    padded_b = _round_up(B, tile_b)
    grid = (padded_b // tile_b,)

    cdt = compute_dtype

    def pad_batch(x):
        if padded_b == B:
            return x
        return jnp.pad(x, ((0, padded_b - B), (0, 0)))

    # Inputs arrive in VMEM already in the matmul operand dtype.
    feat = pad_batch(features.astype(cdt))
    nfeat = pad_batch(next_features.astype(cdt))
    act2d = pad_batch(actions.reshape(B, 1).astype(jnp.int32))

    enc_w = params["enc_w"].astype(cdt)
    enc_b = params["enc_b"].astype(jnp.float32)
    inv_w1a = params["inv_w1a"].astype(cdt)
    inv_w1b = params["inv_w1b"].astype(cdt)
    inv_b1 = params["inv_b1"].astype(jnp.float32)
    # Lane-pad the action (output) dim of the inverse head so pred_act is lane-dense.
    inv_w2 = jnp.pad(params["inv_w2"], ((0, 0), (0, n_act_pad - n_actions))).astype(cdt)
    inv_b2 = jnp.pad(params["inv_b2"], ((0, 0), (0, n_act_pad - n_actions))).astype(jnp.float32)
    fwd_w1a = params["fwd_w1a"].astype(cdt)
    # Row-select path in the kernel: keep fwd_w1b unpadded and exact in f32.
    fwd_w1b = params["fwd_w1b"].astype(jnp.float32)
    fwd_b1 = params["fwd_b1"].astype(jnp.float32)
    fwd_w2 = params["fwd_w2"].astype(cdt)
    fwd_b2 = params["fwd_b2"].astype(jnp.float32)

    batched_inputs = (feat, nfeat, act2d)
    weights = (enc_w, enc_b, inv_w1a, inv_w1b, inv_b1, inv_w2, inv_b2,
               fwd_w1a, fwd_w1b, fwd_b1, fwd_w2, fwd_b2)

    def bspec(x):  # batch-tiled operand
        return pl.BlockSpec((tile_b, x.shape[1]), lambda i: (i, 0))

    def wspec(x):  # weight/bias: constant index_map -> resident across all grid steps
        # TODO(synk): single-buffer these (pipeline_mode=pl.Buffered(1)) and/or
        # K-tile enc_w once top-level pipeline_mode support is confirmed; the
        # double-buffered footprint (~3 MiB here) is accounted for in vmem_limit.
        return pl.BlockSpec(x.shape, lambda i: (0, 0))

    in_specs = [bspec(x) for x in batched_inputs] + [wspec(w) for w in weights]

    out_shapes = (
        jax.ShapeDtypeStruct((padded_b, n_act_pad), jnp.float32),
        jax.ShapeDtypeStruct((padded_b, ICM_EMBED_DIM), jnp.float32),
        jax.ShapeDtypeStruct((padded_b, ICM_EMBED_DIM), jnp.float32),
    )
    out_specs = tuple(pl.BlockSpec((tile_b, s.shape[1]), lambda i: (i, 0))
                      for s in out_shapes)

    # VMEM budget: (double-buffered) resident weights + double-buffered I/O
    # tiles + working set, plus headroom; capped below physical VMEM so Mosaic
    # keeps internal-scratch / pipelining room on every generation.
    isz = lambda x: jnp.dtype(x.dtype).itemsize
    weight_bytes = sum(int(w.size) * isz(w) for w in weights)
    in_tile_bytes = sum(tile_b * x.shape[1] * isz(x) for x in batched_inputs)
    out_tile_bytes = sum(tile_b * s.shape[1] * 4 for s in out_shapes)
    work_bytes = tile_b * (2 * ICM_EMBED_DIM + 2 * HIDDEN + n_act_pad) * 4
    need = 2 * weight_bytes + 2 * (in_tile_bytes + out_tile_bytes) + work_bytes
    try:
        phys_vmem = int(pltpu.get_tpu_info().vmem_capacity_bytes)
    except Exception:  # emulator / unknown backend: assume the smallest (v7x)
        phys_vmem = 64 << 20
    vmem_cap = phys_vmem * 8 // 10          # ~51 MiB on v7x, ~102 MiB on v5e/v6e
    vmem_limit = int(min(max(need + (8 << 20), 16 << 20), vmem_cap))

    flops_per_row = 2 * (2 * fdim * ICM_EMBED_DIM                    # encoder (both inputs)
                         + 2 * ICM_EMBED_DIM * HIDDEN                # inverse layer 1 (two halves)
                         + HIDDEN * n_act_pad                        # inverse layer 2 (lane-padded)
                         + ICM_EMBED_DIM * HIDDEN                    # forward layer 1 (phi half)
                         + HIDDEN * ICM_EMBED_DIM)                   # forward layer 2
    io_bytes = (sum(int(x.size) * isz(x) for x in batched_inputs)
                + sum(int(s.shape[0]) * int(s.shape[1]) * 4 for s in out_shapes))
    cost = pl.CostEstimate(
        flops=padded_b * flops_per_row,
        transcendentals=0,
        bytes_accessed=int(weight_bytes + io_bytes))

    pred_act_p, pred_next_p, next_feat_p = pl.pallas_call(
        icm_kernel,
        grid=grid,
        in_specs=in_specs,
        out_specs=out_specs,
        out_shape=out_shapes,
        compiler_params=pltpu.CompilerParams(
            dimension_semantics=("parallel",),
            vmem_limit_bytes=vmem_limit),
        cost_estimate=cost,
    )(*batched_inputs, *weights)

    return (pred_act_p[:B, :n_actions],
            pred_next_p[:B],
            next_feat_p[:B])


def _torch_linear_init(key, fan_in, fan_out):
    """Deterministic init matching PyTorch nn.Linear's U(-1/sqrt(fan_in), ...).
    Weight returned transposed as (in, out) for x @ W."""
    kw, kb = jax.random.split(key)
    bound = 1.0 / math.sqrt(fan_in)
    w = jax.random.uniform(kw, (fan_in, fan_out), jnp.float32, -bound, bound)
    b = jax.random.uniform(kb, (1, fan_out), jnp.float32, -bound, bound)
    return w, b


def make_params(key, feature_dimension, n_actions):
    keys = jax.random.split(key, 5)
    enc_w, enc_b = _torch_linear_init(keys[0], feature_dimension, ICM_EMBED_DIM)
    inv_w1, inv_b1 = _torch_linear_init(keys[1], ICM_EMBED_DIM * 2, HIDDEN)
    inv_w2, inv_b2 = _torch_linear_init(keys[2], HIDDEN, n_actions)
    fwd_w1, fwd_b1 = _torch_linear_init(keys[3], ICM_EMBED_DIM + n_actions, HIDDEN)
    fwd_w2, fwd_b2 = _torch_linear_init(keys[4], HIDDEN, ICM_EMBED_DIM)
    return {
        "enc_w": enc_w, "enc_b": enc_b,
        # split concat-weights so cat() becomes two matmuls inside the kernel
        "inv_w1a": inv_w1[:ICM_EMBED_DIM], "inv_w1b": inv_w1[ICM_EMBED_DIM:],
        "inv_b1": inv_b1, "inv_w2": inv_w2, "inv_b2": inv_b2,
        "fwd_w1a": fwd_w1[:ICM_EMBED_DIM], "fwd_w1b": fwd_w1[ICM_EMBED_DIM:],
        "fwd_b1": fwd_b1, "fwd_w2": fwd_w2, "fwd_b2": fwd_b2,
    }


def icm_reference(features, next_features, actions, params):
    """Pure-JAX reference mirroring the PyTorch forward."""
    def leaky(x):
        return jnp.where(x > 0, x, LEAKY_SLOPE * x)
    enc_w, enc_b = params["enc_w"], params["enc_b"]
    phi = jnp.maximum(features @ enc_w + enc_b, 0.0)
    phi_n = jnp.maximum(next_features @ enc_w + enc_b, 0.0)
    inv_in = jnp.concatenate([phi, phi_n], axis=1)
    inv_w1 = jnp.concatenate([params["inv_w1a"], params["inv_w1b"]], axis=0)
    pred_act = leaky(inv_in @ inv_w1 + params["inv_b1"]) @ params["inv_w2"] + params["inv_b2"]
    n_actions = pred_act.shape[-1]
    onehot = jax.nn.one_hot(actions, n_actions, dtype=jnp.float32)
    fwd_in = jnp.concatenate([phi, onehot], axis=1)
    fwd_w1 = jnp.concatenate([params["fwd_w1a"], params["fwd_w1b"]], axis=0)
    pred_next = leaky(fwd_in @ fwd_w1 + params["fwd_b1"]) @ params["fwd_w2"] + params["fwd_b2"]
    return pred_act, pred_next, phi_n


if __name__ == "__main__":
    B = 20                      # non-multiple of the tile -> exercises batch padding
    feature_dimension = 32
    n_actions = 4

    key = jax.random.PRNGKey(0)
    k_feat, k_nfeat, k_act, k_params = jax.random.split(key, 4)

    features = jax.random.normal(k_feat, (B, feature_dimension), jnp.float32)
    next_features = jax.random.normal(k_nfeat, (B, feature_dimension), jnp.float32)
    actions = jax.random.randint(k_act, (B,), 0, n_actions, jnp.int32)
    params = make_params(k_params, feature_dimension, n_actions)

    ref_act, ref_next, ref_nf = icm_reference(features, next_features, actions, params)

    # --- exact-parity path: f32 operands, tight tolerance ---
    fwd_f32 = jax.jit(functools.partial(icm_forward, tile_b=8,
                                        compute_dtype=jnp.float32))
    pa32, pn32, nf32 = jax.block_until_ready(
        fwd_f32(features, next_features, actions, params))
    assert pa32.shape == (B, n_actions)
    assert pn32.shape == (B, ICM_EMBED_DIM)
    assert nf32.shape == (B, ICM_EMBED_DIM)
    assert jnp.allclose(pa32, ref_act, atol=1e-4, rtol=1e-4)
    assert jnp.allclose(pn32, ref_next, atol=1e-4, rtol=1e-4)
    assert jnp.allclose(nf32, ref_nf, atol=1e-4, rtol=1e-4)

    # --- default fast path: bf16 matmul operands, f32 accumulation ---
    fwd_bf16 = jax.jit(icm_forward)   # tile_b=256 default, clamped to keep >=2 grid steps
    pab, pnb, nfb = jax.block_until_ready(
        fwd_bf16(features, next_features, actions, params))
    assert pab.shape == (B, n_actions)
    assert pnb.shape == (B, ICM_EMBED_DIM)
    assert nfb.shape == (B, ICM_EMBED_DIM)
    assert jnp.allclose(pab, ref_act, atol=5e-2, rtol=5e-2)
    assert jnp.allclose(pnb, ref_next, atol=5e-2, rtol=5e-2)
    assert jnp.allclose(nfb, ref_nf, atol=5e-2, rtol=5e-2)

    print("KERNEL_OK")
</pallas_src>

<mosaic_0001>
module attributes {stable_mosaic.version = 11 : i64} {
  func.func @icm_kernel(%arg0: i32, %arg1: memref<8x32xf32, #tpu.memory_space<vmem>>, %arg2: memref<8x32xf32, #tpu.memory_space<vmem>>, %arg3: memref<8x1xi32, #tpu.memory_space<vmem>>, %arg4: memref<32x256xf32, #tpu.memory_space<vmem>>, %arg5: memref<1x256xf32, #tpu.memory_space<vmem>>, %arg6: memref<256x512xf32, #tpu.memory_space<vmem>>, %arg7: memref<256x512xf32, #tpu.memory_space<vmem>>, %arg8: memref<1x512xf32, #tpu.memory_space<vmem>>, %arg9: memref<512x128xf32, #tpu.memory_space<vmem>>, %arg10: memref<1x128xf32, #tpu.memory_space<vmem>>, %arg11: memref<256x512xf32, #tpu.memory_space<vmem>>, %arg12: memref<4x512xf32, #tpu.memory_space<vmem>>, %arg13: memref<1x512xf32, #tpu.memory_space<vmem>>, %arg14: memref<512x256xf32, #tpu.memory_space<vmem>>, %arg15: memref<1x256xf32, #tpu.memory_space<vmem>>, %arg16: memref<8x128xf32, #tpu.memory_space<vmem>>, %arg17: memref<8x256xf32, #tpu.memory_space<vmem>>, %arg18: memref<8x256xf32, #tpu.memory_space<vmem>>) attributes {dimension_semantics = [#tpu.dimension_semantics<parallel>], iteration_bounds = array<i64: 3>, scalar_prefetch = 0 : i64, scratch_operands = 0 : i64, tpu.core_type = #tpu.core_type<tc>, window_params = [{transform_indices = @transform_0, window_bounds = array<i64: 8, 32>}, {transform_indices = @transform_1, window_bounds = array<i64: 8, 32>}, {transform_indices = @transform_2, window_bounds = array<i64: 8, 1>}, {pipeline_mode = #tpu.pipeline_mode<synchronous>, transform_indices = @transform_3, window_bounds = array<i64: 32, 256>}, {pipeline_mode = #tpu.pipeline_mode<synchronous>, transform_indices = @transform_4, window_bounds = array<i64: 1, 256>}, {pipeline_mode = #tpu.pipeline_mode<synchronous>, transform_indices = @transform_5, window_bounds = array<i64: 256, 512>}, {pipeline_mode = #tpu.pipeline_mode<synchronous>, transform_indices = @transform_6, window_bounds = array<i64: 256, 512>}, {pipeline_mode = #tpu.pipeline_mode<synchronous>, transform_indices = @transform_7, window_bounds = array<i64: 1, 512>}, {pipeline_mode = #tpu.pipeline_mode<synchronous>, transform_indices = @transform_8, window_bounds = array<i64: 512, 128>}, {pipeline_mode = #tpu.pipeline_mode<synchronous>, transform_indices = @transform_9, window_bounds = array<i64: 1, 128>}, {pipeline_mode = #tpu.pipeline_mode<synchronous>, transform_indices = @transform_10, window_bounds = array<i64: 256, 512>}, {pipeline_mode = #tpu.pipeline_mode<synchronous>, transform_indices = @transform_11, window_bounds = array<i64: 4, 512>}, {pipeline_mode = #tpu.pipeline_mode<synchronous>, transform_indices = @transform_12, window_bounds = array<i64: 1, 512>}, {pipeline_mode = #tpu.pipeline_mode<synchronous>, transform_indices = @transform_13, window_bounds = array<i64: 512, 256>}, {pipeline_mode = #tpu.pipeline_mode<synchronous>, transform_indices = @transform_14, window_bounds = array<i64: 1, 256>}, {transform_indices = @transform_15, window_bounds = array<i64: 8, 128>}, {transform_indices = @transform_16, window_bounds = array<i64: 8, 256>}, {transform_indices = @transform_17, window_bounds = array<i64: 8, 256>}]} {
    %c0 = arith.constant 0 : index
    %c0_0 = arith.constant 0 : index
    %0 = vector.load %arg1[%c0, %c0_0] : memref<8x32xf32, #tpu.memory_space<vmem>>, vector<8x32xf32>
    %c0_1 = arith.constant 0 : index
    %c0_2 = arith.constant 0 : index
    %1 = vector.load %arg4[%c0_1, %c0_2] : memref<32x256xf32, #tpu.memory_space<vmem>>, vector<32x256xf32>
    %cst = arith.constant dense<0.000000e+00> : vector<8x256xf32>
    %2 = tpu.matmul %0, %1, %cst {dimension_numbers = #tpu.dot_dimension_numbers<[1], [0], [0], [1], [0, 0, 1, 1], [], []>} : vector<8x32xf32>, vector<32x256xf32>, vector<8x256xf32> -> vector<8x256xf32>
    %c0_3 = arith.constant 0 : index
    %c0_4 = arith.constant 0 : index
    %3 = vector.load %arg5[%c0_3, %c0_4] : memref<1x256xf32, #tpu.memory_space<vmem>>, vector<1x256xf32>
    %4 = vector.broadcast %3 : vector<1x256xf32> to vector<8x256xf32>
    %5 = arith.addf %2, %4 : vector<8x256xf32>
    %cst_5 = arith.constant 0.000000e+00 : f32
    %6 = vector.broadcast %cst_5 : f32 to vector<8x256xf32>
    %7 = arith.maximumf %5, %6 : vector<8x256xf32>
    %c0_6 = arith.constant 0 : index
    %c0_7 = arith.constant 0 : index
    %8 = vector.load %arg2[%c0_6, %c0_7] : memref<8x32xf32, #tpu.memory_space<vmem>>, vector<8x32xf32>
    %c0_8 = arith.constant 0 : index
    %c0_9 = arith.constant 0 : index
    %9 = vector.load %arg4[%c0_8, %c0_9] : memref<32x256xf32, #tpu.memory_space<vmem>>, vector<32x256xf32>
    %cst_10 = arith.constant dense<0.000000e+00> : vector<8x256xf32>
    %10 = tpu.matmul %8, %9, %cst_10 {dimension_numbers = #tpu.dot_dimension_numbers<[1], [0], [0], [1], [0, 0, 1, 1], [], []>} : vector<8x32xf32>, vector<32x256xf32>, vector<8x256xf32> -> vector<8x256xf32>
    %c0_11 = arith.constant 0 : index
    %c0_12 = arith.constant 0 : index
    %11 = vector.load %arg5[%c0_11, %c0_12] : memref<1x256xf32, #tpu.memory_space<vmem>>, vector<1x256xf32>
    %12 = vector.broadcast %11 : vector<1x256xf32> to vector<8x256xf32>
    %13 = arith.addf %10, %12 : vector<8x256xf32>
    %cst_13 = arith.constant 0.000000e+00 : f32
    %14 = vector.broadcast %cst_13 : f32 to vector<8x256xf32>
    %15 = arith.maximumf %13, %14 : vector<8x256xf32>
    %c0_14 = arith.constant 0 : index
    %c0_15 = arith.constant 0 : index
    %16 = vector.load %arg6[%c0_14, %c0_15] : memref<256x512xf32, #tpu.memory_space<vmem>>, vector<256x512xf32>
    %cst_16 = arith.constant dense<0.000000e+00> : vector<8x512xf32>
    %17 = tpu.matmul %7, %16, %cst_16 {dimension_numbers = #tpu.dot_dimension_numbers<[1], [0], [0], [1], [0, 0, 1, 1], [], []>} : vector<8x256xf32>, vector<256x512xf32>, vector<8x512xf32> -> vector<8x512xf32>
    %c0_17 = arith.constant 0 : index
    %c0_18 = arith.constant 0 : index
    %18 = vector.load %arg7[%c0_17, %c0_18] : memref<256x512xf32, #tpu.memory_space<vmem>>, vector<256x512xf32>
    %cst_19 = arith.constant dense<0.000000e+00> : vector<8x512xf32>
    %19 = tpu.matmul %15, %18, %cst_19 {dimension_numbers = #tpu.dot_dimension_numbers<[1], [0], [0], [1], [0, 0, 1, 1], [], []>} : vector<8x256xf32>, vector<256x512xf32>, vector<8x512xf32> -> vector<8x512xf32>
    %20 = arith.addf %17, %19 : vector<8x512xf32>
    %c0_20 = arith.constant 0 : index
    %c0_21 = arith.constant 0 : index
    %21 = vector.load %arg8[%c0_20, %c0_21] : memref<1x512xf32, #tpu.memory_space<vmem>>, vector<1x512xf32>
    %22 = vector.broadcast %21 : vector<1x512xf32> to vector<8x512xf32>
    %23 = arith.addf %20, %22 : vector<8x512xf32>
    %cst_22 = arith.constant 0.000000e+00 : f32
    %24 = vector.broadcast %cst_22 : f32 to vector<8x512xf32>
    %25 = arith.cmpf ogt, %23, %24 : vector<8x512xf32>
    %cst_23 = arith.constant 0.00999999977 : f32
    %26 = vector.broadcast %cst_23 : f32 to vector<8x512xf32>
    %27 = arith.mulf %26, %23 : vector<8x512xf32>
    %28 = arith.select %25, %23, %27 : vector<8x512xi1>, vector<8x512xf32>
    %c0_24 = arith.constant 0 : index
    %c0_25 = arith.constant 0 : index
    %29 = vector.load %arg9[%c0_24, %c0_25] : memref<512x128xf32, #tpu.memory_space<vmem>>, vector<512x128xf32>
    %cst_26 = arith.constant dense<0.000000e+00> : vector<8x128xf32>
    %30 = tpu.matmul %28, %29, %cst_26 {dimension_numbers = #tpu.dot_dimension_numbers<[1], [0], [0], [1], [0, 0, 1, 1], [], []>} : vector<8x512xf32>, vector<512x128xf32>, vector<8x128xf32> -> vector<8x128xf32>
    %c0_27 = arith.constant 0 : index
    %c0_28 = arith.constant 0 : index
    %31 = vector.load %arg10[%c0_27, %c0_28] : memref<1x128xf32, #tpu.memory_space<vmem>>, vector<1x128xf32>
    %32 = vector.broadcast %31 : vector<1x128xf32> to vector<8x128xf32>
    %33 = arith.addf %30, %32 : vector<8x128xf32>
    %c0_29 = arith.constant 0 : index
    %c0_30 = arith.constant 0 : index
    %34 = vector.load %arg16[%c0_29, %c0_30] : memref<8x128xf32, #tpu.memory_space<vmem>>, vector<8x128xf32>
    tpu.vector_store %arg16[%c0_29, %c0_30], %33 {strides = array<i32>} : memref<8x128xf32, #tpu.memory_space<vmem>>, vector<8x128xf32>,
    %c0_31 = arith.constant 0 : index
    %c0_32 = arith.constant 0 : index
    %35 = vector.load %arg3[%c0_31, %c0_32] : memref<8x1xi32, #tpu.memory_space<vmem>>, vector<8x1xi32>
    %c0_33 = arith.constant 0 : index
    %c0_34 = arith.constant 0 : index
    %36 = vector.load %arg12[%c0_33, %c0_34] : memref<4x512xf32, #tpu.memory_space<vmem>>, vector<4x512xf32>
    %cst_35 = arith.constant 0.000000e+00 : f32
    %37 = vector.broadcast %cst_35 : f32 to vector<8x512xf32>
    %c0_i32 = arith.constant 0 : i32
    %38 = vector.broadcast %c0_i32 : i32 to vector<8x1xi32>
    %39 = arith.cmpi eq, %35, %38 : vector<8x1xi32>
    %40 = vector.extract_strided_slice %36 {offsets = [0, 0], sizes = [1, 512], strides = [1, 1]} : vector<4x512xf32> to vector<1x512xf32>
    %cst_36 = arith.constant 0.000000e+00 : f32
    %41 = vector.shape_cast %39 : vector<8x1xi1> to vector<8x1xi1>
    %42 = vector.broadcast %41 : vector<8x1xi1> to vector<8x512xi1>
    %43 = vector.shape_cast %40 : vector<1x512xf32> to vector<1x512xf32>
    %44 = vector.broadcast %43 : vector<1x512xf32> to vector<8x512xf32>
    %45 = vector.broadcast %cst_36 : f32 to vector<8x512xf32>
    %46 = arith.select %42, %44, %45 : vector<8x512xi1>, vector<8x512xf32>
    %47 = arith.addf %37, %46 : vector<8x512xf32>
    %c1_i32 = arith.constant 1 : i32
    %48 = vector.broadcast %c1_i32 : i32 to vector<8x1xi32>
    %49 = arith.cmpi eq, %35, %48 : vector<8x1xi32>
    %50 = vector.extract_strided_slice %36 {offsets = [1, 0], sizes = [1, 512], strides = [1, 1]} : vector<4x512xf32> to vector<1x512xf32>
    %cst_37 = arith.constant 0.000000e+00 : f32
    %51 = vector.shape_cast %49 : vector<8x1xi1> to vector<8x1xi1>
    %52 = vector.broadcast %51 : vector<8x1xi1> to vector<8x512xi1>
    %53 = vector.shape_cast %50 : vector<1x512xf32> to vector<1x512xf32>
    %54 = vector.broadcast %53 : vector<1x512xf32> to vector<8x512xf32>
    %55 = vector.broadcast %cst_37 : f32 to vector<8x512xf32>
    %56 = arith.select %52, %54, %55 : vector<8x512xi1>, vector<8x512xf32>
    %57 = arith.addf %47, %56 : vector<8x512xf32>
    %c2_i32 = arith.constant 2 : i32
    %58 = vector.broadcast %c2_i32 : i32 to vector<8x1xi32>
    %59 = arith.cmpi eq, %35, %58 : vector<8x1xi32>
    %60 = vector.extract_strided_slice %36 {offsets = [2, 0], sizes = [1, 512], strides = [1, 1]} : vector<4x512xf32> to vector<1x512xf32>
    %cst_38 = arith.constant 0.000000e+00 : f32
    %61 = vector.shape_cast %59 : vector<8x1xi1> to vector<8x1xi1>
    %62 = vector.broadcast %61 : vector<8x1xi1> to vector<8x512xi1>
    %63 = vector.shape_cast %60 : vector<1x512xf32> to vector<1x512xf32>
    %64 = vector.broadcast %63 : vector<1x512xf32> to vector<8x512xf32>
    %65 = vector.broadcast %cst_38 : f32 to vector<8x512xf32>
    %66 = arith.select %62, %64, %65 : vector<8x512xi1>, vector<8x512xf32>
    %67 = arith.addf %57, %66 : vector<8x512xf32>
    %c3_i32 = arith.constant 3 : i32
    %68 = vector.broadcast %c3_i32 : i32 to vector<8x1xi32>
    %69 = arith.cmpi eq, %35, %68 : vector<8x1xi32>
    %70 = vector.extract_strided_slice %36 {offsets = [3, 0], sizes = [1, 512], strides = [1, 1]} : vector<4x512xf32> to vector<1x512xf32>
    %cst_39 = arith.constant 0.000000e+00 : f32
    %71 = vector.shape_cast %69 : vector<8x1xi1> to vector<8x1xi1>
    %72 = vector.broadcast %71 : vector<8x1xi1> to vector<8x512xi1>
    %73 = vector.shape_cast %70 : vector<1x512xf32> to vector<1x512xf32>
    %74 = vector.broadcast %73 : vector<1x512xf32> to vector<8x512xf32>
    %75 = vector.broadcast %cst_39 : f32 to vector<8x512xf32>
    %76 = arith.select %72, %74, %75 : vector<8x512xi1>, vector<8x512xf32>
    %77 = arith.addf %67, %76 : vector<8x512xf32>
    %c0_40 = arith.constant 0 : index
    %c0_41 = arith.constant 0 : index
    %78 = vector.load %arg11[%c0_40, %c0_41] : memref<256x512xf32, #tpu.memory_space<vmem>>, vector<256x512xf32>
    %cst_42 = arith.constant dense<0.000000e+00> : vector<8x512xf32>
    %79 = tpu.matmul %7, %78, %cst_42 {dimension_numbers = #tpu.dot_dimension_numbers<[1], [0], [0], [1], [0, 0, 1, 1], [], []>} : vector<8x256xf32>, vector<256x512xf32>, vector<8x512xf32> -> vector<8x512xf32>
    %80 = arith.addf %79, %77 : vector<8x512xf32>
    %c0_43 = arith.constant 0 : index
    %c0_44 = arith.constant 0 : index
    %81 = vector.load %arg13[%c0_43, %c0_44] : memref<1x512xf32, #tpu.memory_space<vmem>>, vector<1x512xf32>
    %82 = vector.broadcast %81 : vector<1x512xf32> to vector<8x512xf32>
    %83 = arith.addf %80, %82 : vector<8x512xf32>
    %cst_45 = arith.constant 0.000000e+00 : f32
    %84 = vector.broadcast %cst_45 : f32 to vector<8x512xf32>
    %85 = arith.cmpf ogt, %83, %84 : vector<8x512xf32>
    %cst_46 = arith.constant 0.00999999977 : f32
    %86 = vector.broadcast %cst_46 : f32 to vector<8x512xf32>
    %87 = arith.mulf %86, %83 : vector<8x512xf32>
    %88 = arith.select %85, %83, %87 : vector<8x512xi1>, vector<8x512xf32>
    %c0_47 = arith.constant 0 : index
    %c0_48 = arith.constant 0 : index
    %89 = vector.load %arg14[%c0_47, %c0_48] : memref<512x256xf32, #tpu.memory_space<vmem>>, vector<512x256xf32>
    %cst_49 = arith.constant dense<0.000000e+00> : vector<8x256xf32>
    %90 = tpu.matmul %88, %89, %cst_49 {dimension_numbers = #tpu.dot_dimension_numbers<[1], [0], [0], [1], [0, 0, 1, 1], [], []>} : vector<8x512xf32>, vector<512x256xf32>, vector<8x256xf32> -> vector<8x256xf32>
    %c0_50 = arith.constant 0 : index
    %c0_51 = arith.constant 0 : index
    %91 = vector.load %arg15[%c0_50, %c0_51] : memref<1x256xf32, #tpu.memory_space<vmem>>, vector<1x256xf32>
    %92 = vector.broadcast %91 : vector<1x256xf32> to vector<8x256xf32>
    %93 = arith.addf %90, %92 : vector<8x256xf32>
    %c0_52 = arith.constant 0 : index
    %c0_53 = arith.constant 0 : index
    %94 = vector.load %arg17[%c0_52, %c0_53] : memref<8x256xf32, #tpu.memory_space<vmem>>, vector<8x256xf32>
    tpu.vector_store %arg17[%c0_52, %c0_53], %93 {strides = array<i32>} : memref<8x256xf32, #tpu.memory_space<vmem>>, vector<8x256xf32>,
    %c0_54 = arith.constant 0 : index
    %c0_55 = arith.constant 0 : index
    %95 = vector.load %arg18[%c0_54, %c0_55] : memref<8x256xf32, #tpu.memory_space<vmem>>, vector<8x256xf32>
    tpu.vector_store %arg18[%c0_54, %c0_55], %15 {strides = array<i32>} : memref<8x256xf32, #tpu.memory_space<vmem>>, vector<8x256xf32>,
    return
  }
  func.func @transform_0(%arg0: i32) -> (i32, i32) {
    %c0_i32 = arith.constant 0 : i32
    %c0_i32_0 = arith.constant 0 : i32
    return %arg0, %c0_i32 : i32, i32
  }
  func.func @transform_1(%arg0: i32) -> (i32, i32) {
    %c0_i32 = arith.constant 0 : i32
    %c0_i32_0 = arith.constant 0 : i32
    return %arg0, %c0_i32 : i32, i32
  }
  func.func @transform_2(%arg0: i32) -> (i32, i32) {
    %c0_i32 = arith.constant 0 : i32
    %c0_i32_0 = arith.constant 0 : i32
    return %arg0, %c0_i32 : i32, i32
  }
  func.func @transform_3(%arg0: i32) -> (i32, i32) {
    %c0_i32 = arith.constant 0 : i32
    %c0_i32_0 = arith.constant 0 : i32
    %c0_i32_1 = arith.constant 0 : i32
    return %c0_i32, %c0_i32_0 : i32, i32
  }
  func.func @transform_4(%arg0: i32) -> (i32, i32) {
    %c0_i32 = arith.constant 0 : i32
    %c0_i32_0 = arith.constant 0 : i32
    %c0_i32_1 = arith.constant 0 : i32
    return %c0_i32, %c0_i32_0 : i32, i32
  }
  func.func @transform_5(%arg0: i32) -> (i32, i32) {
    %c0_i32 = arith.constant 0 : i32
    %c0_i32_0 = arith.constant 0 : i32
    %c0_i32_1 = arith.constant 0 : i32
    return %c0_i32, %c0_i32_0 : i32, i32
  }
  func.func @transform_6(%arg0: i32) -> (i32, i32) {
    %c0_i32 = arith.constant 0 : i32
    %c0_i32_0 = arith.constant 0 : i32
    %c0_i32_1 = arith.constant 0 : i32
    return %c0_i32, %c0_i32_0 : i32, i32
  }
  func.func @transform_7(%arg0: i32) -> (i32, i32) {
    %c0_i32 = arith.constant 0 : i32
    %c0_i32_0 = arith.constant 0 : i32
    %c0_i32_1 = arith.constant 0 : i32
    return %c0_i32, %c0_i32_0 : i32, i32
  }
  func.func @transform_8(%arg0: i32) -> (i32, i32) {
    %c0_i32 = arith.constant 0 : i32
    %c0_i32_0 = arith.constant 0 : i32
    %c0_i32_1 = arith.constant 0 : i32
    return %c0_i32, %c0_i32_0 : i32, i32
  }
  func.func @transform_9(%arg0: i32) -> (i32, i32) {
    %c0_i32 = arith.constant 0 : i32
    %c0_i32_0 = arith.constant 0 : i32
    %c0_i32_1 = arith.constant 0 : i32
    return %c0_i32, %c0_i32_0 : i32, i32
  }
  func.func @transform_10(%arg0: i32) -> (i32, i32) {
    %c0_i32 = arith.constant 0 : i32
    %c0_i32_0 = arith.constant 0 : i32
    %c0_i32_1 = arith.constant 0 : i32
    return %c0_i32, %c0_i32_0 : i32, i32
  }
  func.func @transform_11(%arg0: i32) -> (i32, i32) {
    %c0_i32 = arith.constant 0 : i32
    %c0_i32_0 = arith.constant 0 : i32
    %c0_i32_1 = arith.constant 0 : i32
    return %c0_i32, %c0_i32_0 : i32, i32
  }
  func.func @transform_12(%arg0: i32) -> (i32, i32) {
    %c0_i32 = arith.constant 0 : i32
    %c0_i32_0 = arith.constant 0 : i32
    %c0_i32_1 = arith.constant 0 : i32
    return %c0_i32, %c0_i32_0 : i32, i32
  }
  func.func @transform_13(%arg0: i32) -> (i32, i32) {
    %c0_i32 = arith.constant 0 : i32
    %c0_i32_0 = arith.constant 0 : i32
    %c0_i32_1 = arith.constant 0 : i32
    return %c0_i32, %c0_i32_0 : i32, i32
  }
  func.func @transform_14(%arg0: i32) -> (i32, i32) {
    %c0_i32 = arith.constant 0 : i32
    %c0_i32_0 = arith.constant 0 : i32
    %c0_i32_1 = arith.constant 0 : i32
    return %c0_i32, %c0_i32_0 : i32, i32
  }
  func.func @transform_15(%arg0: i32) -> (i32, i32) {
    %c0_i32 = arith.constant 0 : i32
    %c0_i32_0 = arith.constant 0 : i32
    return %arg0, %c0_i32 : i32, i32
  }
  func.func @transform_16(%arg0: i32) -> (i32, i32) {
    %c0_i32 = arith.constant 0 : i32
    %c0_i32_0 = arith.constant 0 : i32
    return %arg0, %c0_i32 : i32, i32
  }
  func.func @transform_17(%arg0: i32) -> (i32, i32) {
    %c0_i32 = arith.constant 0 : i32
    %c0_i32_0 = arith.constant 0 : i32
    return %arg0, %c0_i32 : i32, i32
  }
}

</mosaic_0001>

<bundles_post_ra>
// kernel: icm_forward.1
= control target key start
LH: loop header
LB: loop body
LE: loop exit
PB: predicated region body
PF: predicated region fallthrough
CT: control target
= control target key end

     0   :  { %s3777_s0 = inlined_call_operand.vmem [shape: f32[24,32], index: 0, kind: input, shape index: {}]   ;;  %s3778_s1 = inlined_call_operand.vmem [shape: f32[24,32], index: 1, kind: input, shape index: {}]   ;;  %s3779_s2 = inlined_call_operand.vmem [shape: s32[24,1], index: 2, kind: input, shape index: {}]   ;;  %s3780_s3 = inlined_call_operand.vmem [shape: f32[32,256], index: 3, kind: input, shape index: {}]   ;;  %s3781_s4 = inlined_call_operand.vmem [shape: f32[1,256], index: 4, kind: input, shape index: {}]   ;;  %s3782_s5 = inlined_call_operand.vmem [shape: f32[256,512], index: 5, kind: input, shape index: {}]   ;;  %s3783_s6 = inlined_call_operand.hbm [shape: f32[256,512], index: 6, kind: input, shape index: {}]   ;;  %s3784_s7 = inlined_call_operand.vmem [shape: f32[1,512], index: 7, kind: input, shape index: {}]   ;;  %s3785_s8 = inlined_call_operand.vmem [shape: f32[512,128], index: 8, kind: input, shape index: {}]   ;;  %s3786_s9 = inlined_call_operand.vmem [shape: f32[1,128], index: 9, kind: input, shape index: {}]   ;;  %s3787_s10 = inlined_call_operand.hbm [shape: f32[256,512], index: 10, kind: input, shape index: {}]   ;;  %s3788_s11 = inlined_call_operand.vmem [shape: f32[4,512], index: 11, kind: input, shape index: {}]   ;;  %s3789_s12 = inlined_call_operand.vmem [shape: f32[1,512], index: 12, kind: input, shape index: {}]   ;;  %s3790_s13 = inlined_call_operand.hbm [shape: f32[512,256], index: 13, kind: input, shape index: {}]   ;;  %s3791_s14 = inlined_call_operand.vmem [shape: f32[1,256], index: 14, kind: input, shape index: {}]   ;;  %s3792_s15 = inlined_call_operand.vmem [shape: f32[24,128], index: 15, kind: output, shape index: {0}]   ;;  %s3793_s16 = inlined_call_operand.hbm [shape: f32[24,256], index: 16, kind: output, shape index: {1}]   ;;  %s3794_s17 = inlined_call_operand.hbm [shape: f32[24,256], index: 17, kind: output, shape index: {2}]  }
   0x1   :  { %3803 = sst [smem:[#allocation21_spill]] %s3777_s0 }
   0x2   :  { %3804 = sst [smem:[#allocation22_spill]] %s3778_s1 }
   0x3   :  { %3805 = sst [smem:[#allocation23_spill]] %s3783_s6 }
   0x4   :  { %3806 = sst [smem:[#allocation24_spill]] %s3787_s10 }
   0x5   :  { %3807 = sst [smem:[#allocation25_spill]] %s3791_s14 }
   0x6   :  { %3808 = sst [smem:[#allocation26_spill]] %s3793_s16 }
   0x7   :  { %23 = vsyncpa [#allocation3], 0 }
   0x8   :  { %24 = vsyncpa [#allocation6], 0 }
   0x9   :  { %25 = vsyncpa [#allocation4], 0 }
   0xa   :  { %27 = vsyncpa [#allocation4 + $0x1], 0 }
   0xb   :  { %28 = vsyncpa [#allocation10], 0 }
   0xc   :  { %30 = vsyncpa [#allocation10 + $0x1], 0  ;;  %s2848_s24 = smov 0   ;;  %s2850_s25 = smov 0  }
   0xd   :  { %s2852_s26 = smov 0   ;;  %s2854_s27 = smov 0  }
   0xe LB: > { %3809 = sst [smem:[#allocation15_spill]] %s2736_s24  ;;  %s2869_s28 = sadd.s32 4294967295, %s2748_s27   ;;  %s2748_s27 = sphi %s2854_s27, %s3829_s27   ;;  %s2744_s26 = sphi %s2852_s26, %s3831_s26   ;;  %s2740_s25 = sphi %s2850_s25, %s3833_s25   ;;  %s2736_s24 = sphi %s2848_s24, %s3832_s24  }
   0xf   : > { %3810 = sst [smem:[#allocation16_spill]] %s2744_s26  ;;  %s2443_s29 = sadd.s32 4294967294, %s2748_s27  }
  0x10   : > { %3811 = sst [smem:[#allocation17_spill]] %s2748_s27  ;;  %s2873_s0 = sadd.s32 1, %s2748_s27  }
  0x11   : > { %3812 = sst [smem:[#allocation18_spill]] %s2873_s0  ;;  %s399_s30 = sadd.s32 1, %s2744_s26 }
  0x12   : > { %s396_s18 = ssub.s32 %s2748_s27, %s2873_s0  ;;  %p409_p0 = scmp.ne.s32.totalorder %s2744_s26, %s2740_s25 }
  0x13   : > { %p397_p1 = scmp.eq.s32.totalorder %s396_s18, 0  ;;  %p410_p2 = scmp.eq.s32.totalorder %s2869_s28, 2 }
  0x14   : > { %p415_p3 = scmp.ne.s32.totalorder %s2740_s25, %s2736_s24  ;;  %p416_p4 = scmp.eq.s32.totalorder %s2443_s29, 2 }
  0x15   : > { %s2884_s19 = scalar_select %p397_p1, %s2744_s26, %s399_s30  }
  0x16   : > { %p2886_p5 = por %p410_p2, %p409_p0  ;;  %p2890_p6 = por %p416_p4, %p415_p3 }
  0x17   : > { %3813 = sst [smem:[#allocation19_spill]] %s2884_s19  ;;  %p2444_p7 = scmp.ge.s32.totalorder %s2748_s27, 1 }
  0x18   : > { %s3815_s20 = scalar_select %p2890_p6, 1, 0 }
  0x19   : > { %p449_p8 = scmp.lt.s32.totalorder %s2748_s27, 4  ;;  %p2506_p9 = scmp.eq.s32.totalorder %s2869_s28, 0 }
  0x1a   : > { %3816 = sst [smem:[#allocation20_spill]] %s3815_s20  ;;  %s2750_s0 = smov [#allocation5]  }
  0x1b   : > { %p2897_p10 = pnand %p2444_p7, %p449_p8  ;;  %s3818_s10 = sld [smem:[#allocation24_spill]] }
  0x1c   : > { %s3819_s6 = sld [smem:[#allocation23_spill]]  ;;  %s494_s20 = sshll.u32 %s2750_s0, 4  ;;  %s495_s20 = int_to_ptr.vmem [resolvable:$true] %s494_s20 }
  0x1d   : > { %p2489_p11 = pneg %p2897_p10  ;;  %s2751_s22 = smov 512  }
  0x1e   : > { %s2752_s23 = smov 32   ;;  %s2754_s27 = smov [#allocation7]  }
  0x1f   : > { %p2911_p12 = pnand %p2506_p9, %p2489_p11  ;;  %s514_s16 = sshll.u32 %s2754_s27, 4  ;;  %s515_s16 = int_to_ptr.vmem [resolvable:$true] %s514_s16 }
  0x20   : > { %s2755_s0 = smov 256   ;;  %s2756_s14 = smov 16  }
  0x21   : > { %s492_s29 = sshll.u32 %s3818_s10, 4  ;;  %s2753_s10 = smov [#allocation2]   ;;  %s493_s29 = int_to_ptr.hbm [resolvable:$true] %s492_s29 }
  0x22   : > { %s469_s19 = sshll.u32 %s3819_s6, 4  ;;  %s471_s24 = sshll.u32 %s2753_s10, 4  ;;  %s470_s19 = int_to_ptr.hbm [resolvable:$true] %s469_s19  ;;  %s472_s24 = int_to_ptr.vmem [resolvable:$true] %s471_s24 }
  0x23   : > { %2495 = dma.hbm_to_vmem [thread:$0]  (!%p2911_p12), %s493_s29, 16384, %s495_s20, [#allocation6], %s2751_s22, %s2751_s22, %s2752_s23  }
  0x24   : > { %s512_s6 = sshll.u32 %s3790_s13, 4  ;;  %554 = sbr.rel (%p2897_p10) target bundleno = 720 (0x2d0), region = 80  ;;  %s513_s6 = int_to_ptr.hbm [resolvable:$true] %s512_s6 }
  0x25   : > { %2492 = dma.hbm_to_vmem [thread:$0]  (!%p2911_p12), %s470_s19, 16384, %s472_s24, [#allocation3], %s2751_s22, %s2751_s22, %s2752_s23  }
  0x26   : > { %2498 = dma.hbm_to_vmem [thread:$0]  (!%p2911_p12), %s513_s6, 16384, %s515_s16, [#allocation6], %s2755_s0, %s2755_s0, %s2756_s14  }
  0x29   : > { %2719 = dma.done.wait (%p2506_p9), [#allocation3], 16384  }
  0x2a   : > { %2721 = vsyncadd (%p2506_p9), [#allocation3], 4294950912 }
  0x2b   : > { %2723 = dma.done.wait (%p2506_p9), [#allocation6], 32768  }
  0x2c   : > { %2725 = vsyncadd (%p2506_p9), [#allocation6], 4294934528  ;;  %p633_p13 = scmp.lt.s32.totalorder %s2869_s28, 2  ;;  %v656_v0 = vld [vmem:[%s3780_s3 + $0x30] sm:$0xff]  ;;  %v657_v1 = vld [vmem:[%s3780_s3 + $0x38] sm:$0xff]  ;;  %s3822_s21 = sld [smem:[#allocation21_spill]] }
  0x2d   : > { %v654_v2 = vld [vmem:[%s3780_s3 + $0x20] sm:$0xff]  ;;  %726 = vmatpush.msra.mxu2 %v656_v0  ;;  %746 = vmatpush.msra.mxu3 %v657_v1  ;;  %v655_v3 = vld [vmem:[%s3780_s3 + $0x28] sm:$0xff]  ;;  %v652_v4 = vld [vmem:[%s3780_s3 + $0x10] sm:$0xff]  ;;  %vm664_vm0 = vcmask 261120   ;;  %s2980_s30 = sand.u32 1, %s2740_s25  }
  0x2e   : > { %s634_s10 = scalar_select %p633_p13, %s2869_s28, 2  ;;  %v653_v5 = vld [vmem:[%s3780_s3 + $0x18] sm:$0xff]  ;;  %680 = vmatpush.msra.mxu0 %v656_v0  ;;  %700 = vmatpush.msra.mxu1 %v657_v1  ;;  %v650_v6 = vld [vmem:[%s3780_s3] sm:$0xff]  ;;  %v651_v7 = vld [vmem:[%s3780_s3 + $0x8] sm:$0xff] }
  0x2f   : > { %727 = vmatpush.msra.mxu2 %v654_v2  ;;  %747 = vmatpush.msra.mxu3 %v655_v3  ;;  %v944_v10 = vld [vmem:[#allocation2 + $0x1e0] sm:$0xff]  ;;  %v945_v12 = vld [vmem:[#allocation2 + $0x1e8] sm:$0xff]  ;;  %s3802_s18 = sshll.u32 %s2980_s30, 4 }
  0x30   : > { %s2936_s6 = sshll.u32 %s634_s10, 3  ;;  %s3821_s10 = sld [smem:[#allocation22_spill]]  ;;  %681 = vmatpush.msra.mxu0 %v654_v2  ;;  %701 = vmatpush.msra.mxu1 %v655_v3  ;;  %v1008_v11 = vld [vmem:[#allocation2 + $0x3e0] sm:$0xff]  ;;  %v1009_v13 = vld [vmem:[#allocation2 + $0x3e8] sm:$0xff] }
  0x31   : > { %728 = vmatpush.msra.mxu2 %v652_v4  ;;  %748 = vmatpush.msra.mxu3 %v653_v5  ;;  %v940_v14 = vld [vmem:[#allocation2 + $0x1c0] sm:$0xff]  ;;  %v941_v16 = vld [vmem:[#allocation2 + $0x1c8] sm:$0xff]  ;;  %s3003_s20 = scalar_lea.vmem [#allocation9], %s3802_s18  ;;  %s648_s16 = scalar_lea.vmem %s3792_s15, %s2936_s6 }
  0x32   : > { %s636_s29 = scalar_lea.vmem %s3822_s21, %s2936_s6  ;;  %682 = vmatpush.msra.mxu0 %v652_v4  ;;  %702 = vmatpush.msra.mxu1 %v653_v5  ;;  %v1004_v15 = vld [vmem:[#allocation2 + $0x3c0] sm:$0xff]  ;;  %v1005_v17 = vld [vmem:[#allocation2 + $0x3c8] sm:$0xff]  ;;  %s644_s21 = scalar_lea.vmem %s3779_s2, %s2936_s6 }
  0x33   : > { %729 = vmatpush.msra.mxu2 %v650_v6  ;;  %749 = vmatpush.msra.mxu3 %v651_v7  ;;  %v649_v9 = vld [vmem:[%s636_s29] sm:$0xff]  ;;  %v937_v20 = vld [vmem:[#allocation2 + $0x1a8] sm:$0xff]  ;;  %s2269_s19 = sshll.u32 %s3003_s20, 4  ;;  %s2238_s29 = scalar_lea.sflag [#allocation10], %s2980_s30  ;;  %s2270_s19 = int_to_ptr.vmem [resolvable:$true] %s2269_s19 }
  0x34   : > { %683 = vmatpush.msra.mxu0 %v650_v6  ;;  %703 = vmatpush.msra.mxu1 %v651_v7  ;;  %v936_v18 = vld [vmem:[#allocation2 + $0x1a0] sm:$0xff]  ;;  %v1001_v21 = vld [vmem:[#allocation2 + $0x3a8] sm:$0xff] }
  0x35   : > { %2459 = vmatmul.msk.f32.vlgmr.msra.gmra.mxu0 %vm664_vm0, %v649_v9  ;;  %2460 = vmatmul.msk.f32.vlgmr.msra.gmra.mxu1 %vm664_vm0, %v649_v9  ;;  %v1000_v19 = vld [vmem:[#allocation2 + $0x3a0] sm:$0xff]  ;;  %v933_v24 = vld [vmem:[#allocation2 + $0x188] sm:$0xff] }
  0x36   : > { %s640_s14 = scalar_lea.vmem %s3821_s10, %s2936_s6  ;;  %1012 = vmatpush.msrb.mxu0 %v944_v10  ;;  %1032 = vmatpush.msrb.mxu1 %v1008_v11  ;;  %v932_v22 = vld [vmem:[#allocation2 + $0x180] sm:$0xff]  ;;  %v997_v25 = vld [vmem:[#allocation2 + $0x388] sm:$0xff]  ;;  %v946_v10 = vld [vmem:[#allocation2 + $0x1f0] sm:$0xff]  ;;  %s2471_s6 = sshll.u32 %s2869_s28, 4 }
  0x37   : > { %v710_v8 = vld [vmem:[%s640_s14] sm:$0xff]  ;;  %1052 = vmatpush.msrb.mxu2 %v945_v12  ;;  %1072 = vmatpush.msrb.mxu3 %v1009_v13  ;;  %v929_v28 = vld [vmem:[#allocation2 + $0x168] sm:$0xff]  ;;  %v1010_v11 = vld [vmem:[#allocation2 + $0x3f0] sm:$0xff]  ;;  %s2267_s27 = scalar_lea.hbm %s3794_s17, %s2471_s6  ;;  %s2666_s14 = scalar_lea.hbm %s3794_s17, 48 }
  0x38   : > { %2461 = vmatmul.msk.f32.vlgmr.msra.gmra.mxu2 %vm664_vm0, %v710_v8  ;;  %2462 = vmatmul.msk.f32.vlgmr.msra.gmra.mxu3 %vm664_vm0, %v710_v8  ;;  %v996_v23 = vld [vmem:[#allocation2 + $0x380] sm:$0xff]  ;;  %v993_v29 = vld [vmem:[#allocation2 + $0x368] sm:$0xff]  ;;  %v947_v12 = vld [vmem:[#allocation2 + $0x1f8] sm:$0xff] }
  0x39   : > { %1013 = vmatpush.msrb.mxu0 %v940_v14  ;;  %1033 = vmatpush.msrb.mxu1 %v1004_v15  ;;  %v928_v26 = vld [vmem:[#allocation2 + $0x160] sm:$0xff]  ;;  %v925_v32 = vld [vmem:[#allocation2 + $0x148] sm:$0xff]  ;;  %v1011_v13 = vld [vmem:[#allocation2 + $0x3f8] sm:$0xff] }
  0x3a   : > { %1053 = vmatpush.msrb.mxu2 %v941_v16  ;;  %1073 = vmatpush.msrb.mxu3 %v1005_v17  ;;  %v992_v27 = vld [vmem:[#allocation2 + $0x360] sm:$0xff]  ;;  %v989_v33 = vld [vmem:[#allocation2 + $0x348] sm:$0xff]  ;;  %v942_v14 = vld [vmem:[#allocation2 + $0x1d0] sm:$0xff] }
  0x3b   : > { %1014 = vmatpush.msrb.mxu0 %v936_v18  ;;  %1034 = vmatpush.msrb.mxu1 %v1000_v19  ;;  %v924_v30 = vld [vmem:[#allocation2 + $0x140] sm:$0xff]  ;;  %v921_v36 = vld [vmem:[#allocation2 + $0x128] sm:$0xff]  ;;  %v1006_v15 = vld [vmem:[#allocation2 + $0x3d0] sm:$0xff] }
  0x3c   : > { %1054 = vmatpush.msrb.mxu2 %v937_v20  ;;  %1074 = vmatpush.msrb.mxu3 %v1001_v21  ;;  %v988_v31 = vld [vmem:[#allocation2 + $0x340] sm:$0xff]  ;;  %v985_v37 = vld [vmem:[#allocation2 + $0x328] sm:$0xff]  ;;  %v943_v16 = vld [vmem:[#allocation2 + $0x1d8] sm:$0xff] }
  0x3d   : > { %1015 = vmatpush.msrb.mxu0 %v932_v22  ;;  %1035 = vmatpush.msrb.mxu1 %v996_v23  ;;  %v920_v34 = vld [vmem:[#allocation2 + $0x120] sm:$0xff]  ;;  %v917_v40 = vld [vmem:[#allocation2 + $0x108] sm:$0xff]  ;;  %v1007_v17 = vld [vmem:[#allocation2 + $0x3d8] sm:$0xff] }
  0x3e   : > { %1055 = vmatpush.msrb.mxu2 %v933_v24  ;;  %1075 = vmatpush.msrb.mxu3 %v997_v25  ;;  %v984_v35 = vld [vmem:[#allocation2 + $0x320] sm:$0xff]  ;;  %v981_v41 = vld [vmem:[#allocation2 + $0x308] sm:$0xff]  ;;  %v938_v18 = vld [vmem:[#allocation2 + $0x1b0] sm:$0xff] }
  0x3f   : > { %1016 = vmatpush.msrb.mxu0 %v928_v26  ;;  %1036 = vmatpush.msrb.mxu1 %v992_v27  ;;  %v916_v38 = vld [vmem:[#allocation2 + $0x100] sm:$0xff]  ;;  %v913_v44 = vld [vmem:[#allocation2 + $0xe8] sm:$0xff]  ;;  %v1002_v19 = vld [vmem:[#allocation2 + $0x3b0] sm:$0xff] }
  0x40   : > { %1056 = vmatpush.msrb.mxu2 %v929_v28  ;;  %1076 = vmatpush.msrb.mxu3 %v993_v29  ;;  %v980_v39 = vld [vmem:[#allocation2 + $0x300] sm:$0xff]  ;;  %v977_v45 = vld [vmem:[#allocation2 + $0x2e8] sm:$0xff]  ;;  %v939_v20 = vld [vmem:[#allocation2 + $0x1b8] sm:$0xff] }
  0x41   : > { %1017 = vmatpush.msrb.mxu0 %v924_v30  ;;  %1037 = vmatpush.msrb.mxu1 %v988_v31  ;;  %v912_v42 = vld [vmem:[#allocation2 + $0xe0] sm:$0xff]  ;;  %v909_v48 = vld [vmem:[#allocation2 + $0xc8] sm:$0xff]  ;;  %v1003_v21 = vld [vmem:[#allocation2 + $0x3b8] sm:$0xff] }
  0x42   : > { %1057 = vmatpush.msrb.mxu2 %v925_v32  ;;  %1077 = vmatpush.msrb.mxu3 %v989_v33  ;;  %v976_v43 = vld [vmem:[#allocation2 + $0x2e0] sm:$0xff]  ;;  %v973_v49 = vld [vmem:[#allocation2 + $0x2c8] sm:$0xff]  ;;  %v934_v22 = vld [vmem:[#allocation2 + $0x190] sm:$0xff] }
  0x43   : > { %1018 = vmatpush.msrb.mxu0 %v920_v34  ;;  %1038 = vmatpush.msrb.mxu1 %v984_v35  ;;  %v908_v46 = vld [vmem:[#allocation2 + $0xc0] sm:$0xff]  ;;  %v905_v52 = vld [vmem:[#allocation2 + $0xa8] sm:$0xff]  ;;  %v998_v23 = vld [vmem:[#allocation2 + $0x390] sm:$0xff] }
  0x44   : > { %1058 = vmatpush.msrb.mxu2 %v921_v36  ;;  %1078 = vmatpush.msrb.mxu3 %v985_v37  ;;  %v972_v47 = vld [vmem:[#allocation2 + $0x2c0] sm:$0xff]  ;;  %v969_v53 = vld [vmem:[#allocation2 + $0x2a8] sm:$0xff]  ;;  %v935_v24 = vld [vmem:[#allocation2 + $0x198] sm:$0xff] }
  0x45   : > { %1019 = vmatpush.msrb.mxu0 %v916_v38  ;;  %1039 = vmatpush.msrb.mxu1 %v980_v39  ;;  %v904_v50 = vld [vmem:[#allocation2 + $0xa0] sm:$0xff]  ;;  %v901_v56 = vld [vmem:[#allocation2 + $0x88] sm:$0xff]  ;;  %v999_v25 = vld [vmem:[#allocation2 + $0x398] sm:$0xff] }
  0x46   : > { %1059 = vmatpush.msrb.mxu2 %v917_v40  ;;  %1079 = vmatpush.msrb.mxu3 %v981_v41  ;;  %v968_v51 = vld [vmem:[#allocation2 + $0x2a0] sm:$0xff]  ;;  %v965_v57 = vld [vmem:[#allocation2 + $0x288] sm:$0xff]  ;;  %v930_v26 = vld [vmem:[#allocation2 + $0x170] sm:$0xff] }
  0x47   : > { %1020 = vmatpush.msrb.mxu0 %v912_v42  ;;  %1040 = vmatpush.msrb.mxu1 %v976_v43  ;;  %v900_v54 = vld [vmem:[#allocation2 + $0x80] sm:$0xff]  ;;  %v897_v60 = vld [vmem:[#allocation2 + $0x68] sm:$0xff]  ;;  %v994_v27 = vld [vmem:[#allocation2 + $0x370] sm:$0xff] }
  0x48   : > { %1060 = vmatpush.msrb.mxu2 %v913_v44  ;;  %1080 = vmatpush.msrb.mxu3 %v977_v45  ;;  %v964_v55 = vld [vmem:[#allocation2 + $0x280] sm:$0xff]  ;;  %v961_v61 = vld [vmem:[#allocation2 + $0x268] sm:$0xff]  ;;  %v931_v28 = vld [vmem:[#allocation2 + $0x178] sm:$0xff] }
  0x49   : > { %1021 = vmatpush.msrb.mxu0 %v908_v46  ;;  %1041 = vmatpush.msrb.mxu1 %v972_v47  ;;  %v896_v58 = vld [vmem:[#allocation2 + $0x60] sm:$0xff]  ;;  %v893_v0 = vld [vmem:[#allocation2 + $0x48] sm:$0xff]  ;;  %v995_v29 = vld [vmem:[#allocation2 + $0x378] sm:$0xff] }
  0x4a   : > { %1061 = vmatpush.msrb.mxu2 %v909_v48  ;;  %1081 = vmatpush.msrb.mxu3 %v973_v49  ;;  %v960_v59 = vld [vmem:[#allocation2 + $0x260] sm:$0xff]  ;;  %v957_v1 = vld [vmem:[#allocation2 + $0x248] sm:$0xff]  ;;  %v926_v30 = vld [vmem:[#allocation2 + $0x150] sm:$0xff] }
  0x4b   : > { %1022 = vmatpush.msrb.mxu0 %v904_v50  ;;  %1042 = vmatpush.msrb.mxu1 %v968_v51  ;;  %v892_v62 = vld [vmem:[#allocation2 + $0x40] sm:$0xff]  ;;  %v889_v4 = vld [vmem:[#allocation2 + $0x28] sm:$0xff]  ;;  %v990_v31 = vld [vmem:[#allocation2 + $0x350] sm:$0xff] }
  0x4c   : > { %1062 = vmatpush.msrb.mxu2 %v905_v52  ;;  %1082 = vmatpush.msrb.mxu3 %v969_v53  ;;  %v956_v63 = vld [vmem:[#allocation2 + $0x240] sm:$0xff]  ;;  %v953_v5 = vld [vmem:[#allocation2 + $0x228] sm:$0xff]  ;;  %v927_v32 = vld [vmem:[#allocation2 + $0x158] sm:$0xff] }
  0x4d   : > { %1023 = vmatpush.msrb.mxu0 %v900_v54  ;;  %1043 = vmatpush.msrb.mxu1 %v964_v55  ;;  %v888_v2 = vld [vmem:[#allocation2 + $0x20] sm:$0xff]  ;;  %v885_v8 = vld [vmem:[#allocation2 + $0x8] sm:$0xff]  ;;  %v991_v33 = vld [vmem:[#allocation2 + $0x358] sm:$0xff] }
  0x4e   : > { %1063 = vmatpush.msrb.mxu2 %v901_v56  ;;  %1083 = vmatpush.msrb.mxu3 %v965_v57  ;;  %v952_v3 = vld [vmem:[#allocation2 + $0x220] sm:$0xff]  ;;  %v949_v9 = vld [vmem:[#allocation2 + $0x208] sm:$0xff]  ;;  %v922_v34 = vld [vmem:[#allocation2 + $0x130] sm:$0xff] }
  0x4f   : > { %1024 = vmatpush.msrb.mxu0 %v896_v58  ;;  %1044 = vmatpush.msrb.mxu1 %v960_v59  ;;  %v884_v6 = vld [vmem:[#allocation2] sm:$0xff]  ;;  %v986_v35 = vld [vmem:[#allocation2 + $0x330] sm:$0xff]  ;;  %v923_v36 = vld [vmem:[#allocation2 + $0x138] sm:$0xff] }
  0x50   : > { %1064 = vmatpush.msrb.mxu2 %v897_v60  ;;  %1084 = vmatpush.msrb.mxu3 %v961_v61  ;;  %v948_v7 = vld [vmem:[#allocation2 + $0x200] sm:$0xff]  ;;  %v987_v37 = vld [vmem:[#allocation2 + $0x338] sm:$0xff]  ;;  %v918_v38 = vld [vmem:[#allocation2 + $0x110] sm:$0xff] }
  0x51   : > { %1025 = vmatpush.msrb.mxu0 %v892_v62  ;;  %1045 = vmatpush.msrb.mxu1 %v956_v63  ;;  %v982_v39 = vld [vmem:[#allocation2 + $0x310] sm:$0xff]  ;;  %v919_v40 = vld [vmem:[#allocation2 + $0x118] sm:$0xff] }
  0x52   : > { %1065 = vmatpush.msrb.mxu2 %v893_v0  ;;  %1085 = vmatpush.msrb.mxu3 %v957_v1  ;;  %v983_v41 = vld [vmem:[#allocation2 + $0x318] sm:$0xff]  ;;  %v914_v42 = vld [vmem:[#allocation2 + $0xf0] sm:$0xff] }
  0x53   : > { %1026 = vmatpush.msrb.mxu0 %v888_v2  ;;  %1046 = vmatpush.msrb.mxu1 %v952_v3  ;;  %v978_v43 = vld [vmem:[#allocation2 + $0x2f0] sm:$0xff]  ;;  %v915_v44 = vld [vmem:[#allocation2 + $0xf8] sm:$0xff] }
  0x54   : > { %1066 = vmatpush.msrb.mxu2 %v889_v4  ;;  %1086 = vmatpush.msrb.mxu3 %v953_v5  ;;  %v979_v45 = vld [vmem:[#allocation2 + $0x2f8] sm:$0xff]  ;;  %v910_v46 = vld [vmem:[#allocation2 + $0xd0] sm:$0xff] }
  0x55   : > { %1027 = vmatpush.msrb.mxu0 %v884_v6  ;;  %1047 = vmatpush.msrb.mxu1 %v948_v7  ;;  %v974_v47 = vld [vmem:[#allocation2 + $0x2d0] sm:$0xff]  ;;  %v911_v48 = vld [vmem:[#allocation2 + $0xd8] sm:$0xff] }
  0x56   : > { %1067 = vmatpush.msrb.mxu2 %v885_v8  ;;  %1087 = vmatpush.msrb.mxu3 %v949_v9  ;;  %v975_v49 = vld [vmem:[#allocation2 + $0x2d8] sm:$0xff]  ;;  %v906_v50 = vld [vmem:[#allocation2 + $0xb0] sm:$0xff] }
  0x57   : > { %1092 = vmatpush.msra.mxu0 %v946_v10  ;;  %1112 = vmatpush.msra.mxu1 %v1010_v11  ;;  %v970_v51 = vld [vmem:[#allocation2 + $0x2b0] sm:$0xff]  ;;  %v907_v52 = vld [vmem:[#allocation2 + $0xb8] sm:$0xff]  ;;  %v2977_v10 = vld [vmem:[%s3781_s4] sm:$0x3] }
  0x58   : > { %1132 = vmatpush.msra.mxu2 %v947_v12  ;;  %1152 = vmatpush.msra.mxu3 %v1011_v13  ;;  %v971_v53 = vld [vmem:[#allocation2 + $0x2b8] sm:$0xff]  ;;  %v902_v54 = vld [vmem:[#allocation2 + $0x90] sm:$0xff]  ;;  %v660_v11 = vperm.slane %v2977_v10, 0  ;;  %v661_v12 = vperm.slane %v2977_v10, 1  ;;  %v821_v10 = vld [vmem:[%s3782_s5 + $0x208] sm:$0xff] }
  0x59   : > { %1093 = vmatpush.msra.mxu0 %v942_v14  ;;  %1113 = vmatpush.msra.mxu1 %v1006_v15  ;;  %v966_v55 = vld [vmem:[#allocation2 + $0x290] sm:$0xff]  ;;  %v903_v56 = vld [vmem:[#allocation2 + $0x98] sm:$0xff] }
  0x5a   : > { %1133 = vmatpush.msra.mxu2 %v943_v16  ;;  %1153 = vmatpush.msra.mxu3 %v1007_v17  ;;  %v967_v57 = vld [vmem:[#allocation2 + $0x298] sm:$0xff]  ;;  %v898_v58 = vld [vmem:[#allocation2 + $0x70] sm:$0xff] }
  0x5b   : > { %1094 = vmatpush.msra.mxu0 %v938_v18  ;;  %1114 = vmatpush.msra.mxu1 %v1002_v19  ;;  %v962_v59 = vld [vmem:[#allocation2 + $0x270] sm:$0xff]  ;;  %v899_v60 = vld [vmem:[#allocation2 + $0x78] sm:$0xff]  ;;  %v816_v19 = vld [vmem:[%s3782_s5 + $0x1e0] sm:$0xff] }
  0x5c   : > { %1134 = vmatpush.msra.mxu2 %v939_v20  ;;  %1154 = vmatpush.msra.mxu3 %v1003_v21  ;;  %v963_v61 = vld [vmem:[#allocation2 + $0x278] sm:$0xff]  ;;  %v894_v62 = vld [vmem:[#allocation2 + $0x50] sm:$0xff]  ;;  %v880_v20 = vld [vmem:[%s3782_s5 + $0x3e0] sm:$0xff] }
  0x5d   : > { %1095 = vmatpush.msra.mxu0 %v934_v22  ;;  %1115 = vmatpush.msra.mxu1 %v998_v23  ;;  %v958_v63 = vld [vmem:[#allocation2 + $0x250] sm:$0xff]  ;;  %v895_v0 = vld [vmem:[#allocation2 + $0x58] sm:$0xff]  ;;  %v817_v21 = vld [vmem:[%s3782_s5 + $0x1e8] sm:$0xff] }
  0x5e   : > { %1135 = vmatpush.msra.mxu2 %v935_v24  ;;  %1155 = vmatpush.msra.mxu3 %v999_v25  ;;  %v959_v1 = vld [vmem:[#allocation2 + $0x258] sm:$0xff]  ;;  %v890_v2 = vld [vmem:[#allocation2 + $0x30] sm:$0xff]  ;;  %v881_v22 = vld [vmem:[%s3782_s5 + $0x3e8] sm:$0xff] }
  0x5f   : > { %1096 = vmatpush.msra.mxu0 %v930_v26  ;;  %1116 = vmatpush.msra.mxu1 %v994_v27  ;;  %v954_v3 = vld [vmem:[#allocation2 + $0x230] sm:$0xff]  ;;  %v891_v4 = vld [vmem:[#allocation2 + $0x38] sm:$0xff]  ;;  %v812_v23 = vld [vmem:[%s3782_s5 + $0x1c0] sm:$0xff] }
  0x60   : > { %1136 = vmatpush.msra.mxu2 %v931_v28  ;;  %1156 = vmatpush.msra.mxu3 %v995_v29  ;;  %v955_v5 = vld [vmem:[#allocation2 + $0x238] sm:$0xff]  ;;  %v886_v6 = vld [vmem:[#allocation2 + $0x10] sm:$0xff]  ;;  %v876_v24 = vld [vmem:[%s3782_s5 + $0x3c0] sm:$0xff] }
  0x61   : > { %1097 = vmatpush.msra.mxu0 %v926_v30  ;;  %1117 = vmatpush.msra.mxu1 %v990_v31  ;;  %v950_v7 = vld [vmem:[#allocation2 + $0x210] sm:$0xff]  ;;  %v887_v8 = vld [vmem:[#allocation2 + $0x18] sm:$0xff]  ;;  %v813_v25 = vld [vmem:[%s3782_s5 + $0x1c8] sm:$0xff] }
  0x62   : > { %1137 = vmatpush.msra.mxu2 %v927_v32  ;;  %1157 = vmatpush.msra.mxu3 %v991_v33  ;;  %v951_v9 = vld [vmem:[#allocation2 + $0x218] sm:$0xff]  ;;  %v877_v26 = vld [vmem:[%s3782_s5 + $0x3c8] sm:$0xff]  ;;  %v808_v27 = vld [vmem:[%s3782_s5 + $0x1a0] sm:$0xff] }
  0x63   : > { %1098 = vmatpush.msra.mxu0 %v922_v34  ;;  %1118 = vmatpush.msra.mxu1 %v986_v35  ;;  %v872_v28 = vld [vmem:[%s3782_s5 + $0x3a0] sm:$0xff]  ;;  %v809_v29 = vld [vmem:[%s3782_s5 + $0x1a8] sm:$0xff] }
  0x64   : > { %1138 = vmatpush.msra.mxu2 %v923_v36  ;;  %1158 = vmatpush.msra.mxu3 %v987_v37  ;;  %v873_v30 = vld [vmem:[%s3782_s5 + $0x3a8] sm:$0xff]  ;;  %v804_v31 = vld [vmem:[%s3782_s5 + $0x180] sm:$0xff] }
  0x65   : > { %1099 = vmatpush.msra.mxu0 %v918_v38  ;;  %1119 = vmatpush.msra.mxu1 %v982_v39  ;;  %v868_v32 = vld [vmem:[%s3782_s5 + $0x380] sm:$0xff]  ;;  %v805_v33 = vld [vmem:[%s3782_s5 + $0x188] sm:$0xff] }
  0x66   : > { %1139 = vmatpush.msra.mxu2 %v919_v40  ;;  %1159 = vmatpush.msra.mxu3 %v983_v41  ;;  %v869_v34 = vld [vmem:[%s3782_s5 + $0x388] sm:$0xff]  ;;  %v800_v35 = vld [vmem:[%s3782_s5 + $0x160] sm:$0xff] }
  0x67   : > { %1100 = vmatpush.msra.mxu0 %v914_v42  ;;  %1120 = vmatpush.msra.mxu1 %v978_v43  ;;  %v864_v36 = vld [vmem:[%s3782_s5 + $0x360] sm:$0xff]  ;;  %v801_v37 = vld [vmem:[%s3782_s5 + $0x168] sm:$0xff] }
  0x68   : > { %1140 = vmatpush.msra.mxu2 %v915_v44  ;;  %1160 = vmatpush.msra.mxu3 %v979_v45  ;;  %v865_v38 = vld [vmem:[%s3782_s5 + $0x368] sm:$0xff]  ;;  %v796_v39 = vld [vmem:[%s3782_s5 + $0x140] sm:$0xff] }
  0x69   : > { %1101 = vmatpush.msra.mxu0 %v910_v46  ;;  %1121 = vmatpush.msra.mxu1 %v974_v47  ;;  %v860_v40 = vld [vmem:[%s3782_s5 + $0x340] sm:$0xff]  ;;  %v797_v41 = vld [vmem:[%s3782_s5 + $0x148] sm:$0xff] }
  0x6a   : > { %1141 = vmatpush.msra.mxu2 %v911_v48  ;;  %1161 = vmatpush.msra.mxu3 %v975_v49  ;;  %v861_v42 = vld [vmem:[%s3782_s5 + $0x348] sm:$0xff]  ;;  %v792_v43 = vld [vmem:[%s3782_s5 + $0x120] sm:$0xff] }
  0x6b   : > { %1102 = vmatpush.msra.mxu0 %v906_v50  ;;  %1122 = vmatpush.msra.mxu1 %v970_v51  ;;  %v856_v44 = vld [vmem:[%s3782_s5 + $0x320] sm:$0xff]  ;;  %v793_v45 = vld [vmem:[%s3782_s5 + $0x128] sm:$0xff] }
  0x6c   : > { %1142 = vmatpush.msra.mxu2 %v907_v52  ;;  %1162 = vmatpush.msra.mxu3 %v971_v53  ;;  %v857_v46 = vld [vmem:[%s3782_s5 + $0x328] sm:$0xff]  ;;  %v788_v47 = vld [vmem:[%s3782_s5 + $0x100] sm:$0xff] }
  0x6d   : > { %1103 = vmatpush.msra.mxu0 %v902_v54  ;;  %1123 = vmatpush.msra.mxu1 %v966_v55  ;;  %v852_v48 = vld [vmem:[%s3782_s5 + $0x300] sm:$0xff]  ;;  %v789_v49 = vld [vmem:[%s3782_s5 + $0x108] sm:$0xff] }
  0x6e   : > { %1143 = vmatpush.msra.mxu2 %v903_v56  ;;  %1163 = vmatpush.msra.mxu3 %v967_v57  ;;  %v853_v50 = vld [vmem:[%s3782_s5 + $0x308] sm:$0xff]  ;;  %v784_v51 = vld [vmem:[%s3782_s5 + $0xe0] sm:$0xff] }
  0x6f   : > { %1104 = vmatpush.msra.mxu0 %v898_v58  ;;  %1124 = vmatpush.msra.mxu1 %v962_v59  ;;  %v848_v52 = vld [vmem:[%s3782_s5 + $0x2e0] sm:$0xff]  ;;  %v785_v53 = vld [vmem:[%s3782_s5 + $0xe8] sm:$0xff] }
  0x70   : > { %1144 = vmatpush.msra.mxu2 %v899_v60  ;;  %1164 = vmatpush.msra.mxu3 %v963_v61  ;;  %v849_v54 = vld [vmem:[%s3782_s5 + $0x2e8] sm:$0xff]  ;;  %v780_v55 = vld [vmem:[%s3782_s5 + $0xc0] sm:$0xff] }
  0x71   : > { %1105 = vmatpush.msra.mxu0 %v894_v62  ;;  %1125 = vmatpush.msra.mxu1 %v958_v63  ;;  %v844_v56 = vld [vmem:[%s3782_s5 + $0x2c0] sm:$0xff]  ;;  %v781_v57 = vld [vmem:[%s3782_s5 + $0xc8] sm:$0xff] }
  0x72   : > { %1145 = vmatpush.msra.mxu2 %v895_v0  ;;  %1165 = vmatpush.msra.mxu3 %v959_v1  ;;  %v845_v58 = vld [vmem:[%s3782_s5 + $0x2c8] sm:$0xff]  ;;  %v776_v59 = vld [vmem:[%s3782_s5 + $0xa0] sm:$0xff] }
  0x73   : > { %1106 = vmatpush.msra.mxu0 %v890_v2  ;;  %1126 = vmatpush.msra.mxu1 %v954_v3  ;;  %v840_v60 = vld [vmem:[%s3782_s5 + $0x2a0] sm:$0xff]  ;;  %v777_v61 = vld [vmem:[%s3782_s5 + $0xa8] sm:$0xff] }
  0x74   : > { %1146 = vmatpush.msra.mxu2 %v891_v4  ;;  %1166 = vmatpush.msra.mxu3 %v955_v5  ;;  %v841_v62 = vld [vmem:[%s3782_s5 + $0x2a8] sm:$0xff]  ;;  %v772_v63 = vld [vmem:[%s3782_s5 + $0x80] sm:$0xff] }
  0x75   : > { %1107 = vmatpush.msra.mxu0 %v886_v6  ;;  %1127 = vmatpush.msra.mxu1 %v950_v7  ;;  %v836_v0 = vld [vmem:[%s3782_s5 + $0x280] sm:$0xff]  ;;  %v773_v1 = vld [vmem:[%s3782_s5 + $0x88] sm:$0xff] }
  0x76   : > { %1147 = vmatpush.msra.mxu2 %v887_v8  ;;  %1167 = vmatpush.msra.mxu3 %v951_v9  ;;  %v837_v2 = vld [vmem:[%s3782_s5 + $0x288] sm:$0xff]  ;;  %v768_v3 = vld [vmem:[%s3782_s5 + $0x60] sm:$0xff] }
  0x77   : > { %v832_v4 = vld [vmem:[%s3782_s5 + $0x260] sm:$0xff]  ;;  %v769_v6 = vld [vmem:[%s3782_s5 + $0x68] sm:$0xff] }
  0x78   : > { %v833_v7 = vld [vmem:[%s3782_s5 + $0x268] sm:$0xff]  ;;  %v764_v8 = vld [vmem:[%s3782_s5 + $0x40] sm:$0xff] }
  0x79   : > { %v828_v9 = vld [vmem:[%s3782_s5 + $0x240] sm:$0xff] }
  0xb2   : > { %v685_v5 = vpop.f32.mrf.mxu0 }
  0xbb   : > { %v731_v13 = vpop.f32.mrf.mxu2  ;;  %v751_v14 = vpop.f32.mrf.mxu3 }
  0xbc   : > { %v732_v15 = vadd.f32 %v731_v13, %v660_v11  ;;  %v752_v16 = vadd.f32 %v751_v14, %v661_v12  ;;  %v686_v13 = vadd.f32 %v685_v5, %v660_v11  ;;  %v765_v14 = vld [vmem:[%s3782_s5 + $0x48] sm:$0xff]  ;;  %v774_v5 = vld [vmem:[%s3782_s5 + $0x90] sm:$0xff] }
  0xbd   : > { %v761_v11 = vld [vmem:[%s3782_s5 + $0x28] sm:$0xff] }
  0xbe   : > { %v754_v17 = vmax.f32 %v732_v15, 0.0  ;;  %v755_v18 = vmax.f32 %v752_v16, 0.0  ;;  %v829_v15 = vld [vmem:[%s3782_s5 + $0x248] sm:$0xff]  ;;  %v705_v16 = vpop.f32.mrf.mxu1 }
  0xc0   : > { %1028 = vmatmul.f32.vlgmr.msrb.gmra.mxu0 %v754_v17  ;;  %1048 = vmatmul.f32.vlgmr.msrb.gmra.mxu1 %v755_v18  ;;  %2226 = vst [vmem:[%s3003_s20] sm:$0xff] %v754_v17 }
  0xc1   : > { %1068 = vmatmul.f32.vlgmr.msrb.gmra.mxu2 %v754_v17  ;;  %1088 = vmatmul.f32.vlgmr.msrb.gmra.mxu3 %v755_v18  ;;  %2227 = vst [vmem:[%s3003_s20 + $0x8] sm:$0xff] %v755_v18 }
  0xc2   : > { %1172 = vmatpush.msrb.mxu0 %v816_v19  ;;  %1192 = vmatpush.msrb.mxu1 %v880_v20  ;;  %v825_v19 = vld [vmem:[%s3782_s5 + $0x228] sm:$0xff]  ;;  %v706_v20 = vadd.f32 %v705_v16, %v661_v12  ;;  %v818_v12 = vld [vmem:[%s3782_s5 + $0x1f0] sm:$0xff] }
  0xc3   : > { %1212 = vmatpush.msrb.mxu2 %v817_v21  ;;  %1232 = vmatpush.msrb.mxu3 %v881_v22  ;;  %v756_v21 = vld [vmem:[%s3782_s5] sm:$0xff]  ;;  %v766_v16 = vld [vmem:[%s3782_s5 + $0x50] sm:$0xff] }
  0xc4   : > { %1173 = vmatpush.msrb.mxu0 %v812_v23  ;;  %1193 = vmatpush.msrb.mxu1 %v876_v24  ;;  %v820_v22 = vld [vmem:[%s3782_s5 + $0x200] sm:$0xff]  ;;  %v3185_v23 = vmax.f32 %v686_v13, 0.0  ;;  %v757_v24 = vld [vmem:[%s3782_s5 + $0x8] sm:$0xff]  ;;  %v834_v13 = vld [vmem:[%s3782_s5 + $0x270] sm:$0xff] }
  0xc5   : > { %1213 = vmatpush.msrb.mxu2 %v813_v25  ;;  %1233 = vmatpush.msrb.mxu3 %v877_v26  ;;  %v882_v25 = vld [vmem:[%s3782_s5 + $0x3f0] sm:$0xff]  ;;  %v3199_v26 = vmax.f32 %v706_v20, 0.0 }
  0xc6   : > { %1174 = vmatpush.msrb.mxu0 %v808_v27  ;;  %1194 = vmatpush.msrb.mxu1 %v872_v28  ;;  %v819_v27 = vld [vmem:[%s3782_s5 + $0x1f8] sm:$0xff]  ;;  %v826_v20 = vld [vmem:[%s3782_s5 + $0x230] sm:$0xff] }
  0xc7   : > { %1214 = vmatpush.msrb.mxu2 %v809_v29  ;;  %1234 = vmatpush.msrb.mxu3 %v873_v30  ;;  %v883_v28 = vld [vmem:[%s3782_s5 + $0x3f8] sm:$0xff]  ;;  %v814_v29 = vld [vmem:[%s3782_s5 + $0x1d0] sm:$0xff] }
  0xc8   : > { %1175 = vmatpush.msrb.mxu0 %v804_v31  ;;  %1195 = vmatpush.msrb.mxu1 %v868_v32  ;;  %v878_v30 = vld [vmem:[%s3782_s5 + $0x3d0] sm:$0xff]  ;;  %v815_v31 = vld [vmem:[%s3782_s5 + $0x1d8] sm:$0xff] }
  0xc9   : > { %1215 = vmatpush.msrb.mxu2 %v805_v33  ;;  %1235 = vmatpush.msrb.mxu3 %v869_v34  ;;  %v879_v32 = vld [vmem:[%s3782_s5 + $0x3d8] sm:$0xff]  ;;  %v810_v33 = vld [vmem:[%s3782_s5 + $0x1b0] sm:$0xff] }
  0xca   : > { %1108 = vmatmul.f32.vlgmr.msra.gmra.mxu0 %v754_v17  ;;  %1128 = vmatmul.f32.vlgmr.msra.gmra.mxu1 %v755_v18  ;;  %v874_v34 = vld [vmem:[%s3782_s5 + $0x3b0] sm:$0xff] }
  0xcb   : > { %1148 = vmatmul.f32.vlgmr.msra.gmra.mxu2 %v754_v17  ;;  %1168 = vmatmul.f32.vlgmr.msra.gmra.mxu3 %v755_v18  ;;  %v760_v17 = vld [vmem:[%s3782_s5 + $0x20] sm:$0xff] }
  0xcc   : > { %1176 = vmatpush.msrb.mxu0 %v800_v35  ;;  %1196 = vmatpush.msrb.mxu1 %v864_v36  ;;  %v824_v18 = vld [vmem:[%s3782_s5 + $0x220] sm:$0xff]  ;;  %v811_v35 = vld [vmem:[%s3782_s5 + $0x1b8] sm:$0xff] }
  0xcd   : > { %1216 = vmatpush.msrb.mxu2 %v801_v37  ;;  %1236 = vmatpush.msrb.mxu3 %v865_v38  ;;  %v875_v36 = vld [vmem:[%s3782_s5 + $0x3b8] sm:$0xff]  ;;  %v806_v37 = vld [vmem:[%s3782_s5 + $0x190] sm:$0xff] }
  0xce   : > { %1177 = vmatpush.msrb.mxu0 %v796_v39  ;;  %1197 = vmatpush.msrb.mxu1 %v860_v40  ;;  %v870_v38 = vld [vmem:[%s3782_s5 + $0x390] sm:$0xff]  ;;  %v807_v39 = vld [vmem:[%s3782_s5 + $0x198] sm:$0xff] }
  0xcf   : > { %1217 = vmatpush.msrb.mxu2 %v797_v41  ;;  %1237 = vmatpush.msrb.mxu3 %v861_v42  ;;  %v871_v40 = vld [vmem:[%s3782_s5 + $0x398] sm:$0xff]  ;;  %v802_v41 = vld [vmem:[%s3782_s5 + $0x170] sm:$0xff] }
  0xd0   : > { %1178 = vmatpush.msrb.mxu0 %v792_v43  ;;  %1198 = vmatpush.msrb.mxu1 %v856_v44  ;;  %v866_v42 = vld [vmem:[%s3782_s5 + $0x370] sm:$0xff]  ;;  %v803_v43 = vld [vmem:[%s3782_s5 + $0x178] sm:$0xff] }
  0xd1   : > { %1218 = vmatpush.msrb.mxu2 %v793_v45  ;;  %1238 = vmatpush.msrb.mxu3 %v857_v46  ;;  %v867_v44 = vld [vmem:[%s3782_s5 + $0x378] sm:$0xff]  ;;  %v798_v45 = vld [vmem:[%s3782_s5 + $0x150] sm:$0xff] }
  0xd2   : > { %1179 = vmatpush.msrb.mxu0 %v788_v47  ;;  %1199 = vmatpush.msrb.mxu1 %v852_v48  ;;  %v862_v46 = vld [vmem:[%s3782_s5 + $0x350] sm:$0xff]  ;;  %v799_v47 = vld [vmem:[%s3782_s5 + $0x158] sm:$0xff] }
  0xd3   : > { %1219 = vmatpush.msrb.mxu2 %v789_v49  ;;  %1239 = vmatpush.msrb.mxu3 %v853_v50  ;;  %v863_v48 = vld [vmem:[%s3782_s5 + $0x358] sm:$0xff]  ;;  %v794_v49 = vld [vmem:[%s3782_s5 + $0x130] sm:$0xff] }
  0xd4   : > { %1180 = vmatpush.msrb.mxu0 %v784_v51  ;;  %1200 = vmatpush.msrb.mxu1 %v848_v52  ;;  %v858_v50 = vld [vmem:[%s3782_s5 + $0x330] sm:$0xff]  ;;  %v795_v51 = vld [vmem:[%s3782_s5 + $0x138] sm:$0xff] }
  0xd5   : > { %1220 = vmatpush.msrb.mxu2 %v785_v53  ;;  %1240 = vmatpush.msrb.mxu3 %v849_v54  ;;  %v859_v52 = vld [vmem:[%s3782_s5 + $0x338] sm:$0xff]  ;;  %v790_v53 = vld [vmem:[%s3782_s5 + $0x110] sm:$0xff] }
  0xd6   : > { %1181 = vmatpush.msrb.mxu0 %v780_v55  ;;  %1201 = vmatpush.msrb.mxu1 %v844_v56  ;;  %v854_v54 = vld [vmem:[%s3782_s5 + $0x310] sm:$0xff]  ;;  %v791_v55 = vld [vmem:[%s3782_s5 + $0x118] sm:$0xff] }
  0xd7   : > { %1221 = vmatpush.msrb.mxu2 %v781_v57  ;;  %1241 = vmatpush.msrb.mxu3 %v845_v58  ;;  %v855_v56 = vld [vmem:[%s3782_s5 + $0x318] sm:$0xff]  ;;  %v786_v57 = vld [vmem:[%s3782_s5 + $0xf0] sm:$0xff] }
  0xd8   : > { %1182 = vmatpush.msrb.mxu0 %v776_v59  ;;  %1202 = vmatpush.msrb.mxu1 %v840_v60  ;;  %v850_v58 = vld [vmem:[%s3782_s5 + $0x2f0] sm:$0xff]  ;;  %v787_v59 = vld [vmem:[%s3782_s5 + $0xf8] sm:$0xff] }
  0xd9   : > { %1222 = vmatpush.msrb.mxu2 %v777_v61  ;;  %1242 = vmatpush.msrb.mxu3 %v841_v62  ;;  %v851_v60 = vld [vmem:[%s3782_s5 + $0x2f8] sm:$0xff]  ;;  %v782_v61 = vld [vmem:[%s3782_s5 + $0xd0] sm:$0xff] }
  0xda   : > { %1183 = vmatpush.msrb.mxu0 %v772_v63  ;;  %1203 = vmatpush.msrb.mxu1 %v836_v0  ;;  %v846_v62 = vld [vmem:[%s3782_s5 + $0x2d0] sm:$0xff]  ;;  %v783_v63 = vld [vmem:[%s3782_s5 + $0xd8] sm:$0xff] }
  0xdb   : > { %1223 = vmatpush.msrb.mxu2 %v773_v1  ;;  %1243 = vmatpush.msrb.mxu3 %v837_v2  ;;  %v847_v0 = vld [vmem:[%s3782_s5 + $0x2d8] sm:$0xff]  ;;  %v778_v1 = vld [vmem:[%s3782_s5 + $0xb0] sm:$0xff] }
  0xdc   : > { %1184 = vmatpush.msrb.mxu0 %v768_v3  ;;  %1204 = vmatpush.msrb.mxu1 %v832_v4  ;;  %v842_v2 = vld [vmem:[%s3782_s5 + $0x2b0] sm:$0xff]  ;;  %v779_v3 = vld [vmem:[%s3782_s5 + $0xb8] sm:$0xff] }
  0xdd   : > { %1224 = vmatpush.msrb.mxu2 %v769_v6  ;;  %1244 = vmatpush.msrb.mxu3 %v833_v7  ;;  %v843_v4 = vld [vmem:[%s3782_s5 + $0x2b8] sm:$0xff]  ;;  %v838_v6 = vld [vmem:[%s3782_s5 + $0x290] sm:$0xff] }
  0xde   : > { %1185 = vmatpush.msrb.mxu0 %v764_v8  ;;  %1205 = vmatpush.msrb.mxu1 %v828_v9  ;;  %v775_v7 = vld [vmem:[%s3782_s5 + $0x98] sm:$0xff]  ;;  %v770_v9 = vld [vmem:[%s3782_s5 + $0x70] sm:$0xff] }
  0xdf   : > { %1225 = vmatpush.msrb.mxu2 %v765_v14  ;;  %1245 = vmatpush.msrb.mxu3 %v829_v15  ;;  %v839_v8 = vld [vmem:[%s3782_s5 + $0x298] sm:$0xff] }
  0xe0   : > { %1186 = vmatpush.msrb.mxu0 %v760_v17  ;;  %1206 = vmatpush.msrb.mxu1 %v824_v18  ;;  %v771_v14 = vld [vmem:[%s3782_s5 + $0x78] sm:$0xff]  ;;  %v830_v17 = vld [vmem:[%s3782_s5 + $0x250] sm:$0xff] }
  0xe1   : > { %1226 = vmatpush.msrb.mxu2 %v761_v11  ;;  %1246 = vmatpush.msrb.mxu3 %v825_v19  ;;  %v835_v15 = vld [vmem:[%s3782_s5 + $0x278] sm:$0xff]  ;;  %v762_v19 = vld [vmem:[%s3782_s5 + $0x30] sm:$0xff] }
  0xe2   : > { %1187 = vmatpush.msrb.mxu0 %v756_v21  ;;  %1207 = vmatpush.msrb.mxu1 %v820_v22  ;;  %v767_v18 = vld [vmem:[%s3782_s5 + $0x58] sm:$0xff] }
  0xe3   : > { %1227 = vmatpush.msrb.mxu2 %v757_v24  ;;  %1247 = vmatpush.msrb.mxu3 %v821_v10  ;;  %v831_v11 = vld [vmem:[%s3782_s5 + $0x258] sm:$0xff]  ;;  %v758_v24 = vld [vmem:[%s3782_s5 + $0x10] sm:$0xff] }
  0xe4   : > { %1188 = vmatmul.f32.vlgmr.msrb.gmra.mxu0 %v3185_v23  ;;  %1228 = vmatmul.f32.vlgmr.msrb.gmra.mxu2 %v3185_v23  ;;  %v763_v21 = vld [vmem:[%s3782_s5 + $0x38] sm:$0xff]  ;;  %v822_v10 = vld [vmem:[%s3782_s5 + $0x210] sm:$0xff] }
  0xe5   : > { %1252 = vmatpush.msra.mxu0 %v818_v12  ;;  %1272 = vmatpush.msra.mxu1 %v882_v25  ;;  %v827_v22 = vld [vmem:[%s3782_s5 + $0x238] sm:$0xff] }
  0xe6   : > { %1292 = vmatpush.msra.mxu2 %v819_v27  ;;  %1312 = vmatpush.msra.mxu3 %v883_v28  ;;  %v759_v12 = vld [vmem:[%s3782_s5 + $0x18] sm:$0xff] }
  0xe7   : > { %1208 = vmatmul.f32.vlgmr.msrb.gmra.mxu1 %v3199_v26  ;;  %1248 = vmatmul.f32.vlgmr.msrb.gmra.mxu3 %v3199_v26  ;;  %v823_v25 = vld [vmem:[%s3782_s5 + $0x218] sm:$0xff] }
  0xe8   : > { %1253 = vmatpush.msra.mxu0 %v814_v29  ;;  %1273 = vmatpush.msra.mxu1 %v878_v30  ;;  %v1373_v27 = vld [vmem:[%s3785_s8 + $0x78] sm:$0xff]  ;;  %v1372_v29 = vld [vmem:[%s3785_s8 + $0x70] sm:$0xff] }
  0xe9   : > { %1293 = vmatpush.msra.mxu2 %v815_v31  ;;  %1313 = vmatpush.msra.mxu3 %v879_v32  ;;  %v1389_v28 = vld [vmem:[%s3785_s8 + $0xf8] sm:$0xff]  ;;  %v1388_v30 = vld [vmem:[%s3785_s8 + $0xf0] sm:$0xff]  ;;  %v1371_v31 = vld [vmem:[%s3785_s8 + $0x68] sm:$0xff] }
  0xea   : > { %1254 = vmatpush.msra.mxu0 %v810_v33  ;;  %1274 = vmatpush.msra.mxu1 %v874_v34  ;;  %v1387_v32 = vld [vmem:[%s3785_s8 + $0xe8] sm:$0xff]  ;;  %v1370_v33 = vld [vmem:[%s3785_s8 + $0x60] sm:$0xff] }
  0xeb   : > { %1294 = vmatpush.msra.mxu2 %v811_v35  ;;  %1314 = vmatpush.msra.mxu3 %v875_v36  ;;  %v1386_v34 = vld [vmem:[%s3785_s8 + $0xe0] sm:$0xff]  ;;  %v1369_v35 = vld [vmem:[%s3785_s8 + $0x58] sm:$0xff] }
  0xec   : > { %1255 = vmatpush.msra.mxu0 %v806_v37  ;;  %1275 = vmatpush.msra.mxu1 %v870_v38  ;;  %v1385_v36 = vld [vmem:[%s3785_s8 + $0xd8] sm:$0xff]  ;;  %v1368_v37 = vld [vmem:[%s3785_s8 + $0x50] sm:$0xff] }
  0xed   : > { %1295 = vmatpush.msra.mxu2 %v807_v39  ;;  %1315 = vmatpush.msra.mxu3 %v871_v40  ;;  %v1384_v38 = vld [vmem:[%s3785_s8 + $0xd0] sm:$0xff]  ;;  %v1367_v39 = vld [vmem:[%s3785_s8 + $0x48] sm:$0xff] }
  0xee   : > { %1256 = vmatpush.msra.mxu0 %v802_v41  ;;  %1276 = vmatpush.msra.mxu1 %v866_v42  ;;  %v1383_v40 = vld [vmem:[%s3785_s8 + $0xc8] sm:$0xff]  ;;  %v1366_v41 = vld [vmem:[%s3785_s8 + $0x40] sm:$0xff] }
  0xef   : > { %1296 = vmatpush.msra.mxu2 %v803_v43  ;;  %1316 = vmatpush.msra.mxu3 %v867_v44  ;;  %v1382_v42 = vld [vmem:[%s3785_s8 + $0xc0] sm:$0xff]  ;;  %v1365_v43 = vld [vmem:[%s3785_s8 + $0x38] sm:$0xff]  ;;  %v1364_v44 = vld [vmem:[%s3785_s8 + $0x30] sm:$0xff] }
  0xf0   : > { %1257 = vmatpush.msra.mxu0 %v798_v45  ;;  %1277 = vmatpush.msra.mxu1 %v862_v46  ;;  %v1363_v45 = vld [vmem:[%s3785_s8 + $0x28] sm:$0xff]  ;;  %v1362_v46 = vld [vmem:[%s3785_s8 + $0x20] sm:$0xff] }
  0xf1   : > { %1297 = vmatpush.msra.mxu2 %v799_v47  ;;  %1317 = vmatpush.msra.mxu3 %v863_v48  ;;  %v1381_v47 = vld [vmem:[%s3785_s8 + $0xb8] sm:$0xff] }
  0xf2   : > { %1258 = vmatpush.msra.mxu0 %v794_v49  ;;  %1278 = vmatpush.msra.mxu1 %v858_v50  ;;  %v1361_v48 = vld [vmem:[%s3785_s8 + $0x18] sm:$0xff]  ;;  %v1380_v49 = vld [vmem:[%s3785_s8 + $0xb0] sm:$0xff] }
  0xf3   : > { %1298 = vmatpush.msra.mxu2 %v795_v51  ;;  %1318 = vmatpush.msra.mxu3 %v859_v52  ;;  %v1360_v50 = vld [vmem:[%s3785_s8 + $0x10] sm:$0xff]  ;;  %v1379_v51 = vld [vmem:[%s3785_s8 + $0xa8] sm:$0xff] }
  0xf4   : > { %1259 = vmatpush.msra.mxu0 %v790_v53  ;;  %1279 = vmatpush.msra.mxu1 %v854_v54  ;;  %v1359_v52 = vld [vmem:[%s3785_s8 + $0x8] sm:$0xff]  ;;  %v1378_v53 = vld [vmem:[%s3785_s8 + $0xa0] sm:$0xff] }
  0xf5   : > { %1299 = vmatpush.msra.mxu2 %v791_v55  ;;  %1319 = vmatpush.msra.mxu3 %v855_v56  ;;  %v1358_v54 = vld [vmem:[%s3785_s8] sm:$0xff]  ;;  %v1377_v55 = vld [vmem:[%s3785_s8 + $0x98] sm:$0xff] }
  0xf6   : > { %1260 = vmatpush.msra.mxu0 %v786_v57  ;;  %1280 = vmatpush.msra.mxu1 %v850_v58  ;;  %v1405_v56 = vld [vmem:[%s3785_s8 + $0x178] sm:$0xff]  ;;  %v1676_v57 = vld [vmem:[#allocation5 + $0x1e0] sm:$0xff]  ;;  %v1376_v58 = vld [vmem:[%s3785_s8 + $0x90] sm:$0xff] }
  0xf7   : > { %1300 = vmatpush.msra.mxu2 %v787_v59  ;;  %1320 = vmatpush.msra.mxu3 %v851_v60  ;;  %v1404_v59 = vld [vmem:[%s3785_s8 + $0x170] sm:$0xff]  ;;  %v1672_v60 = vld [vmem:[#allocation5 + $0x1c0] sm:$0xff] }
  0xf8   : > { %1261 = vmatpush.msra.mxu0 %v782_v61  ;;  %1281 = vmatpush.msra.mxu1 %v846_v62  ;;  %v1375_v61 = vld [vmem:[%s3785_s8 + $0x88] sm:$0xff] }
  0xf9   : > { %1301 = vmatpush.msra.mxu2 %v783_v63  ;;  %1321 = vmatpush.msra.mxu3 %v847_v0  ;;  %v1403_v62 = vld [vmem:[%s3785_s8 + $0x168] sm:$0xff]  ;;  %v1668_v63 = vld [vmem:[#allocation5 + $0x1a0] sm:$0xff] }
  0xfa   : > { %1262 = vmatpush.msra.mxu0 %v778_v1  ;;  %1282 = vmatpush.msra.mxu1 %v842_v2  ;;  %v1374_v0 = vld [vmem:[%s3785_s8 + $0x80] sm:$0xff]  ;;  %v1421_v2 = vld [vmem:[%s3785_s8 + $0x1f8] sm:$0xff] }
  0xfb   : > { %1302 = vmatpush.msra.mxu2 %v779_v3  ;;  %1322 = vmatpush.msra.mxu3 %v843_v4  ;;  %v1402_v1 = vld [vmem:[%s3785_s8 + $0x160] sm:$0xff] }
  0xfc   : > { %1263 = vmatpush.msra.mxu0 %v774_v5  ;;  %1283 = vmatpush.msra.mxu1 %v838_v6  ;;  %v1664_v3 = vld [vmem:[#allocation5 + $0x180] sm:$0xff]  ;;  %v1401_v5 = vld [vmem:[%s3785_s8 + $0x158] sm:$0xff]  ;;  %v1420_v6 = vld [vmem:[%s3785_s8 + $0x1f0] sm:$0xff] }
  0xfd   : > { %1303 = vmatpush.msra.mxu2 %v775_v7  ;;  %1323 = vmatpush.msra.mxu3 %v839_v8  ;;  %v1740_v4 = vld [vmem:[#allocation5 + $0x3e0] sm:$0xff] }
  0xfe   : > { %1264 = vmatpush.msra.mxu0 %v770_v9  ;;  %1284 = vmatpush.msra.mxu1 %v834_v13  ;;  %v1660_v7 = vld [vmem:[#allocation5 + $0x160] sm:$0xff]  ;;  %v1400_v9 = vld [vmem:[%s3785_s8 + $0x150] sm:$0xff]  ;;  %v1419_v13 = vld [vmem:[%s3785_s8 + $0x1e8] sm:$0xff] }
  0xff   : > { %1304 = vmatpush.msra.mxu2 %v771_v14  ;;  %1324 = vmatpush.msra.mxu3 %v835_v15  ;;  %v1736_v8 = vld [vmem:[#allocation5 + $0x3c0] sm:$0xff] }
 0x100   : > { %1265 = vmatpush.msra.mxu0 %v766_v16  ;;  %1285 = vmatpush.msra.mxu1 %v830_v17  ;;  %v1656_v14 = vld [vmem:[#allocation5 + $0x140] sm:$0xff]  ;;  %v1399_v17 = vld [vmem:[%s3785_s8 + $0x148] sm:$0xff] }
 0x101   : > { %1305 = vmatpush.msra.mxu2 %v767_v18  ;;  %1325 = vmatpush.msra.mxu3 %v831_v11  ;;  %v1732_v15 = vld [vmem:[#allocation5 + $0x3a0] sm:$0xff] }
 0x102   : > { %1266 = vmatpush.msra.mxu0 %v762_v19  ;;  %1286 = vmatpush.msra.mxu1 %v826_v20  ;;  %v1418_v16 = vld [vmem:[%s3785_s8 + $0x1e0] sm:$0xff]  ;;  %v1417_v19 = vld [vmem:[%s3785_s8 + $0x1d8] sm:$0xff] }
 0x103   : > { %1306 = vmatpush.msra.mxu2 %v763_v21  ;;  %1326 = vmatpush.msra.mxu3 %v827_v22  ;;  %v1652_v18 = vld [vmem:[#allocation5 + $0x120] sm:$0xff] }
 0x104   : > { %1267 = vmatpush.msra.mxu0 %v758_v24  ;;  %1287 = vmatpush.msra.mxu1 %v822_v10  ;;  %v1728_v11 = vld [vmem:[#allocation5 + $0x380] sm:$0xff]  ;;  %v1416_v24 = vld [vmem:[%s3785_s8 + $0x1d0] sm:$0xff]  ;;  %v1397_v10 = vld [vmem:[%s3785_s8 + $0x138] sm:$0xff] }
 0x105   : > { %1307 = vmatpush.msra.mxu2 %v759_v12  ;;  %1327 = vmatpush.msra.mxu3 %v823_v25  ;;  %v1398_v20 = vld [vmem:[%s3785_s8 + $0x140] sm:$0xff] }
 0x106   : > { %1268 = vmatmul.f32.vlgmr.msra.gmra.mxu0 %v3185_v23  ;;  %1288 = vmatmul.f32.vlgmr.msra.gmra.mxu1 %v3199_v26  ;;  %v1648_v21 = vld [vmem:[#allocation5 + $0x100] sm:$0xff] }
 0x107   : > { %1308 = vmatmul.f32.vlgmr.msra.gmra.mxu2 %v3185_v23  ;;  %1328 = vmatmul.f32.vlgmr.msra.gmra.mxu3 %v3199_v26  ;;  %v1724_v22 = vld [vmem:[#allocation5 + $0x360] sm:$0xff] }
 0x108   : > { %1426 = vmatpush.msrb.mxu0 %v1373_v27  ;;  %1446 = vmatpush.msrb.mxu1 %v1389_v28  ;;  %v1644_v12 = vld [vmem:[#allocation5 + $0xe0] sm:$0xff]  ;;  %v1415_v27 = vld [vmem:[%s3785_s8 + $0x1c8] sm:$0xff]  ;;  %v1396_v28 = vld [vmem:[%s3785_s8 + $0x130] sm:$0xff] }
 0x109   : > { %1466 = vmatpush.msrb.mxu2 %v1405_v56  ;;  %1486 = vmatpush.msrb.mxu3 %v1421_v2  ;;  %v1720_v25 = vld [vmem:[#allocation5 + $0x340] sm:$0xff] }
 0x10a   : > { %1427 = vmatpush.msrb.mxu0 %v1372_v29  ;;  %1447 = vmatpush.msrb.mxu1 %v1388_v30  ;;  %v1640_v29 = vld [vmem:[#allocation5 + $0xc0] sm:$0xff] }
 0x10b   : > { %1467 = vmatpush.msrb.mxu2 %v1404_v59  ;;  %1487 = vmatpush.msrb.mxu3 %v1420_v6  ;;  %v1716_v30 = vld [vmem:[#allocation5 + $0x320] sm:$0xff]  ;;  %v1673_v59 = vld [vmem:[#allocation5 + $0x1c8] sm:$0xff] }
 0x10c   : > { %1428 = vmatpush.msrb.mxu0 %v1371_v31  ;;  %1448 = vmatpush.msrb.mxu1 %v1387_v32  ;;  %v1414_v31 = vld [vmem:[%s3785_s8 + $0x1c0] sm:$0xff]  ;;  %v1395_v32 = vld [vmem:[%s3785_s8 + $0x128] sm:$0xff] }
 0x10d   : > { %1468 = vmatpush.msrb.mxu2 %v1403_v62  ;;  %1488 = vmatpush.msrb.mxu3 %v1419_v13  ;;  %v2757_v62 = vmov 0   ;;  %v1741_v6 = vld [vmem:[#allocation5 + $0x3e8] sm:$0xff] }
 0x10e   : > { %1429 = vmatpush.msrb.mxu0 %v1370_v33  ;;  %1449 = vmatpush.msrb.mxu1 %v1386_v34  ;;  %v1636_v33 = vld [vmem:[#allocation5 + $0xa0] sm:$0xff]  ;;  %v1737_v13 = vld [vmem:[#allocation5 + $0x3c8] sm:$0xff] }
 0x10f   : > { %1469 = vmatpush.msrb.mxu2 %v1402_v1  ;;  %1489 = vmatpush.msrb.mxu3 %v1418_v16  ;;  %v1712_v34 = vld [vmem:[#allocation5 + $0x300] sm:$0xff] }
 0x110   : > { %1430 = vmatpush.msrb.mxu0 %v1369_v35  ;;  %1450 = vmatpush.msrb.mxu1 %v1385_v36  ;;  %v1394_v35 = vld [vmem:[%s3785_s8 + $0x120] sm:$0xff]  ;;  %v1413_v36 = vld [vmem:[%s3785_s8 + $0x1b8] sm:$0xff] }
 0x111   : > { %1470 = vmatpush.msrb.mxu2 %v1401_v5  ;;  %1490 = vmatpush.msrb.mxu3 %v1417_v19  ;;  %v1665_v5 = vld [vmem:[#allocation5 + $0x188] sm:$0xff] }
 0x112   : > { %1431 = vmatpush.msrb.mxu0 %v1368_v37  ;;  %1451 = vmatpush.msrb.mxu1 %v1384_v38  ;;  %v1632_v37 = vld [vmem:[#allocation5 + $0x80] sm:$0xff]  ;;  %v1729_v19 = vld [vmem:[#allocation5 + $0x388] sm:$0xff] }
 0x113   : > { %1471 = vmatpush.msrb.mxu2 %v1400_v9  ;;  %1491 = vmatpush.msrb.mxu3 %v1416_v24  ;;  %v1708_v38 = vld [vmem:[#allocation5 + $0x2e0] sm:$0xff]  ;;  %v1661_v9 = vld [vmem:[#allocation5 + $0x168] sm:$0xff] }
 0x114   : > { %1432 = vmatpush.msrb.mxu0 %v1367_v39  ;;  %1452 = vmatpush.msrb.mxu1 %v1383_v40  ;;  %v1393_v39 = vld [vmem:[%s3785_s8 + $0x118] sm:$0xff]  ;;  %v1412_v40 = vld [vmem:[%s3785_s8 + $0x1b0] sm:$0xff] }
 0x115   : > { %1472 = vmatpush.msrb.mxu2 %v1399_v17  ;;  %1492 = vmatpush.msrb.mxu3 %v1415_v27  ;;  %v1641_v27 = vld [vmem:[#allocation5 + $0xc8] sm:$0xff] }
 0x116   : > { %1433 = vmatpush.msrb.mxu0 %v1366_v41  ;;  %1453 = vmatpush.msrb.mxu1 %v1382_v42  ;;  %v1628_v41 = vld [vmem:[#allocation5 + $0x60] sm:$0xff] }
 0x117   : > { %1473 = vmatpush.msrb.mxu2 %v1398_v20  ;;  %1493 = vmatpush.msrb.mxu3 %v1414_v31  ;;  %v1704_v42 = vld [vmem:[#allocation5 + $0x2c0] sm:$0xff]  ;;  %v1649_v20 = vld [vmem:[#allocation5 + $0x108] sm:$0xff] }
 0x118   : > { %1434 = vmatpush.msrb.mxu0 %v1365_v43  ;;  %1454 = vmatpush.msrb.mxu1 %v1381_v47  ;;  %v1392_v43 = vld [vmem:[%s3785_s8 + $0x110] sm:$0xff]  ;;  %v1391_v47 = vld [vmem:[%s3785_s8 + $0x108] sm:$0xff] }
 0x119   : > { %1474 = vmatpush.msrb.mxu2 %v1397_v10  ;;  %1494 = vmatpush.msrb.mxu3 %v1413_v36  ;;  %v1645_v10 = vld [vmem:[#allocation5 + $0xe8] sm:$0xff] }
 0x11a   : > { %1435 = vmatpush.msrb.mxu0 %v1364_v44  ;;  %1455 = vmatpush.msrb.mxu1 %v1380_v49  ;;  %v1411_v44 = vld [vmem:[%s3785_s8 + $0x1a8] sm:$0xff]  ;;  %v1620_v49 = vld [vmem:[#allocation5 + $0x20] sm:$0xff] }
 0x11b   : > { %1475 = vmatpush.msrb.mxu2 %v1396_v28  ;;  %1495 = vmatpush.msrb.mxu3 %v1412_v40  ;;  %v1717_v28 = vld [vmem:[#allocation5 + $0x328] sm:$0xff] }
 0x11c   : > { %1436 = vmatpush.msrb.mxu0 %v1363_v45  ;;  %1456 = vmatpush.msrb.mxu1 %v1379_v51  ;;  %v1624_v45 = vld [vmem:[#allocation5 + $0x40] sm:$0xff] }
 0x11d   : > { %1476 = vmatpush.msrb.mxu2 %v1395_v32  ;;  %1496 = vmatpush.msrb.mxu3 %v1411_v44  ;;  %v1390_v51 = vld [vmem:[%s3785_s8 + $0x100] sm:$0xff]  ;;  %v1637_v32 = vld [vmem:[#allocation5 + $0xa8] sm:$0xff] }
 0x11e   : > { %1437 = vmatpush.msrb.mxu0 %v1362_v46  ;;  %1457 = vmatpush.msrb.mxu1 %v1378_v53  ;;  %v1700_v46 = vld [vmem:[#allocation5 + $0x2a0] sm:$0xff] }
 0x11f   : > { %1477 = vmatpush.msrb.mxu2 %v1394_v35  ;;  %v1616_v53 = vld [vmem:[#allocation5] sm:$0xff]  ;;  %2553 = vset.pattern.permute.xlu0 %v2757_v62 }
 0x120   : > { %1438 = vmatpush.msrb.mxu0 %v1361_v48  ;;  %1458 = vmatpush.msrb.mxu1 %v1377_v55  ;;  %v1410_v48 = vld [vmem:[%s3785_s8 + $0x1a0] sm:$0xff]  ;;  %v1677_v55 = vld [vmem:[#allocation5 + $0x1e8] sm:$0xff] }
 0x121   : > { %1478 = vmatpush.msrb.mxu2 %v1393_v39  ;;  %1497 = vmatpush.msrb.mxu3 %v1410_v48  ;;  %v1709_v39 = vld [vmem:[#allocation5 + $0x2e8] sm:$0xff] }
 0x122   : > { %1439 = vmatpush.msrb.mxu0 %v1360_v50  ;;  %1459 = vmatpush.msrb.mxu1 %v1376_v58  ;;  %v1696_v50 = vld [vmem:[#allocation5 + $0x280] sm:$0xff]  ;;  %v1701_v48 = vld [vmem:[#allocation5 + $0x2a8] sm:$0xff] }
 0x123   : > { %1479 = vmatpush.msrb.mxu2 %v1392_v43  ;;  %v1688_v58 = vld [vmem:[#allocation5 + $0x240] sm:$0xff]  ;;  %2554 = vset.pattern.permute.xlu1 %v2757_v62  ;;  %v1705_v43 = vld [vmem:[#allocation5 + $0x2c8] sm:$0xff] }
 0x124   : > { %1440 = vmatpush.msrb.mxu0 %v1359_v52  ;;  %1460 = vmatpush.msrb.mxu1 %v1375_v61  ;;  %v1409_v52 = vld [vmem:[%s3785_s8 + $0x198] sm:$0xff]  ;;  %v1407_v61 = vld [vmem:[%s3785_s8 + $0x188] sm:$0xff] }
 0x125   : > { %1480 = vmatpush.msrb.mxu2 %v1391_v47  ;;  %1498 = vmatpush.msrb.mxu3 %v1409_v52  ;;  %v1625_v47 = vld [vmem:[#allocation5 + $0x48] sm:$0xff]  ;;  %v1678_v52 = vld [vmem:[#allocation5 + $0x1f0] sm:$0xff] }
 0x126   : > { %1441 = vmatpush.msrb.mxu0 %v1358_v54  ;;  %1461 = vmatpush.msrb.mxu1 %v1374_v0  ;;  %v1692_v54 = vld [vmem:[#allocation5 + $0x260] sm:$0xff]  ;;  %v1669_v0 = vld [vmem:[#allocation5 + $0x1a8] sm:$0xff] }
 0x127   : > { %1481 = vmatpush.msrb.mxu2 %v1390_v51 }
 0x128   : > { %1744 = vmatpush.msra.mxu0 %v1676_v57  ;;  %1764 = vmatpush.msra.mxu1 %v1740_v4  ;;  %v1408_v57 = vld [vmem:[%s3785_s8 + $0x190] sm:$0xff]  ;;  %v1680_v4 = vld [vmem:[#allocation5 + $0x200] sm:$0xff] }
 0x129   : > { %1784 = vmatpush.msra.mxu2 %v1677_v55  ;;  %1499 = vmatpush.msrb.mxu3 %v1408_v57  ;;  %v1674_v57 = vld [vmem:[#allocation5 + $0x1d0] sm:$0xff] }
 0x12a   : > { %1745 = vmatpush.msra.mxu0 %v1672_v60  ;;  %1765 = vmatpush.msra.mxu1 %v1736_v8  ;;  %v1507_v60 = vld [vmem:[%s644_s21] sm:$0xff]  ;;  %s2271_s21 = sshll.u32 %s2267_s27, 4  ;;  %s2272_s21 = int_to_ptr.hbm [resolvable:$true] %s2271_s21 }
 0x12b   : > { %vm1510_vm1 = vcmp.eq.s32.totalorder %v1507_v60, 0  ;;  %1785 = vmatpush.msra.mxu2 %v1673_v59  ;;  %1500 = vmatpush.msrb.mxu3 %v1407_v61  ;;  %vm1564_vm2 = vcmp.eq.s32.totalorder %v1507_v60, 2  ;;  %vm1538_vm3 = vcmp.eq.s32.totalorder %v1507_v60, 1  ;;  %vm1590_vm4 = vcmp.eq.s32.totalorder %v1507_v60, 3  ;;  %v1693_v59 = vld [vmem:[#allocation5 + $0x268] sm:$0xff]  ;;  %v1670_v61 = vld [vmem:[#allocation5 + $0x1b0] sm:$0xff] }
 0x12c   : > { %1746 = vmatpush.msra.mxu0 %v1668_v63  ;;  %1766 = vmatpush.msra.mxu1 %v1732_v15  ;;  %v1684_v63 = vld [vmem:[#allocation5 + $0x220] sm:$0xff]  ;;  %v1511_v2 = vsel %vm1510_vm1, 1, %v2757_v62  ;;  %v1733_v15 = vld [vmem:[#allocation5 + $0x3a8] sm:$0xff]  ;;  %v1539_v17 = vsel %vm1538_vm3, 1, %v2757_v62  ;;  %v1591_v24 = vsel %vm1590_vm4, 1, %v2757_v62  ;;  %s2660_s22 = sshra.s32 %s2272_s21, 4  ;;  %s2661_s22 = int_to_ptr.hbm [resolvable:$true] %s2660_s22 }
 0x12d   : > { %1513 = vperm.xlu0 %2553, %v1511_v2   ;;  %1786 = vmatpush.msra.mxu2 %v1669_v0  ;;  %v1666_v0 = vld [vmem:[#allocation5 + $0x190] sm:$0xff]  ;;  %s2662_s23 = scalar_lea.hbm %s2661_s22, 16  ;;  %p2667_p3 = scmp.lt.s32.totalorder %s2661_s22, %s3794_s17 }
 0x12e   : > { %1747 = vmatpush.msra.mxu0 %v1664_v3  ;;  %1767 = vmatpush.msra.mxu1 %v1728_v11  ;;  %v1406_v3 = vld [vmem:[%s3785_s8 + $0x180] sm:$0xff]  ;;  %v1653_v11 = vld [vmem:[#allocation5 + $0x128] sm:$0xff]  ;;  %p2663_p0 = scmp.ne.s32.totalorder %s2661_s22, %s2662_s23  ;;  %p2668_p4 = scmp.lt.s32.totalorder %s2666_s14, %s2662_s23 }
 0x12f   : > { %1501 = vmatpush.msrb.mxu3 %v1406_v3  ;;  %1787 = vmatpush.msra.mxu2 %v1665_v5  ;;  %v1685_v3 = vld [vmem:[#allocation5 + $0x228] sm:$0xff]  ;;  %v1738_v5 = vld [vmem:[#allocation5 + $0x3d0] sm:$0xff] }
 0x130   : > { %1748 = vmatpush.msra.mxu0 %v1660_v7  ;;  %1768 = vmatpush.msra.mxu1 %v1724_v22  ;;  %v1565_v7 = vsel %vm1564_vm2, 1, %v2757_v62  ;;  %v1689_v62 = vld [vmem:[#allocation5 + $0x248] sm:$0xff]  ;;  %p2664_p1 = pnand %p2663_p0, %p2886_p5  ;;  %p2669_p7 = por %p2668_p4, %p2667_p3 }
 0x131   : > { %1804 = vmatpush.msra.mxu3 %v1741_v6  ;;  %1567 = vperm.xlu1 %2554, %v1565_v7   ;;  %v1681_v6 = vld [vmem:[#allocation5 + $0x208] sm:$0xff]  ;;  %v1658_v7 = vld [vmem:[#allocation5 + $0x150] sm:$0xff] }
 0x132   : > { %1749 = vmatpush.msra.mxu0 %v1656_v14  ;;  %1769 = vmatpush.msra.mxu1 %v1720_v25  ;;  %v1657_v14 = vld [vmem:[#allocation5 + $0x148] sm:$0xff]  ;;  %p2665_p2 = pneg %p2664_p1 }
 0x133   : > { %1788 = vmatpush.msra.mxu2 %v1661_v9  ;;  %1805 = vmatpush.msra.mxu3 %v1737_v13  ;;  %v1654_v9 = vld [vmem:[#allocation5 + $0x130] sm:$0xff] }
 0x134   : > { %1750 = vmatpush.msra.mxu0 %v1652_v18  ;;  %1770 = vmatpush.msra.mxu1 %v1716_v30  ;;  %v3603_v30 = vld [vmem:[%s3784_s7] sm:$0xf]  ;;  %v1730_v13 = vld [vmem:[#allocation5 + $0x390] sm:$0xff]  ;;  %p2670_p8 = pnand %p2669_p7, %p2665_p2 }
 0x135   : > { %1789 = vmatpush.msra.mxu2 %v1657_v14  ;;  %1806 = vmatpush.msra.mxu3 %v1733_v15  ;;  %v1334_v36 = vperm.slane %v3603_v30, 0  ;;  %v1650_v14 = vld [vmem:[#allocation5 + $0x110] sm:$0xff] }
 0x136   : > { %1751 = vmatpush.msra.mxu0 %v1648_v21  ;;  %1771 = vmatpush.msra.mxu1 %v1712_v34  ;;  %v1725_v21 = vld [vmem:[#allocation5 + $0x368] sm:$0xff]  ;;  %v1726_v15 = vld [vmem:[#allocation5 + $0x370] sm:$0xff] }
 0x137   : > { %1541 = vperm.xlu0 %2553, %v1539_v17   ;;  %1790 = vmatpush.msra.mxu2 %v1653_v11  ;;  %v1722_v17 = vld [vmem:[#allocation5 + $0x350] sm:$0xff] }
 0x138   : > { %1752 = vmatpush.msra.mxu0 %v1644_v12  ;;  %1772 = vmatpush.msra.mxu1 %v1708_v38  ;;  %v1721_v12 = vld [vmem:[#allocation5 + $0x348] sm:$0xff]  ;;  %v1642_v11 = vld [vmem:[#allocation5 + $0xd0] sm:$0xff] }
 0x139   : > { %1807 = vmatpush.msra.mxu3 %v1729_v19  ;;  %1791 = vmatpush.msra.mxu2 %v1649_v20  ;;  %v1633_v38 = vld [vmem:[#allocation5 + $0x88] sm:$0xff]  ;;  %v1718_v19 = vld [vmem:[#allocation5 + $0x330] sm:$0xff] }
 0x13a   : > { %1753 = vmatpush.msra.mxu0 %v1640_v29  ;;  %1773 = vmatpush.msra.mxu1 %v1704_v42  ;;  %v1629_v42 = vld [vmem:[#allocation5 + $0x68] sm:$0xff]  ;;  %v1638_v20 = vld [vmem:[#allocation5 + $0xb0] sm:$0xff] }
 0x13b   : > { %1808 = vmatpush.msra.mxu3 %v1725_v21  ;;  %1593 = vperm.xlu1 %2554, %v1591_v24   ;;  %v1714_v21 = vld [vmem:[#allocation5 + $0x310] sm:$0xff] }
 0x13c   : > { %1754 = vmatpush.msra.mxu0 %v1636_v33  ;;  %1774 = vmatpush.msra.mxu1 %v1700_v46  ;;  %v1713_v33 = vld [vmem:[#allocation5 + $0x308] sm:$0xff]  ;;  %v1634_v24 = vld [vmem:[#allocation5 + $0x90] sm:$0xff] }
 0x13d   : > { %v3582_v56 = vpop.f32.mrf.mxu0  ;;  %v1049_v1 = vpop.f32.mrf.mxu1  ;;  %1792 = vmatpush.msra.mxu2 %v1645_v10  ;;  %1809 = vmatpush.msra.mxu3 %v1721_v12  ;;  %v1710_v10 = vld [vmem:[#allocation5 + $0x2f0] sm:$0xff] }
 0x13e   : > { %1755 = vmatpush.msra.mxu0 %v1632_v37  ;;  %1775 = vmatpush.msra.mxu1 %v1696_v50  ;;  %v1050_v29 = vadd.f32 %v1049_v1, %v3582_v56  ;;  %v1335_v50 = vperm.slane %v3603_v30, 1  ;;  %v1742_v1 = vld [vmem:[#allocation5 + $0x3f0] sm:$0xff] }
 0x13f   : > { %1793 = vmatpush.msra.mxu2 %v1641_v27  ;;  %1810 = vmatpush.msra.mxu3 %v1717_v28  ;;  %v1630_v27 = vld [vmem:[#allocation5 + $0x70] sm:$0xff] }
 0x140   : > { %1756 = vmatpush.msra.mxu0 %v1628_v41  ;;  %1776 = vmatpush.msra.mxu1 %v1692_v54  ;;  %v1697_v54 = vld [vmem:[#allocation5 + $0x288] sm:$0xff]  ;;  %v1706_v28 = vld [vmem:[#allocation5 + $0x2d0] sm:$0xff] }
 0x141   : > { %1794 = vmatpush.msra.mxu2 %v1637_v32  ;;  %1811 = vmatpush.msra.mxu3 %v1713_v33  ;;  %v1336_v32 = vperm.slane %v3603_v30, 2  ;;  %v1626_v33 = vld [vmem:[#allocation5 + $0x50] sm:$0xff] }
 0x142   : > { %1757 = vmatpush.msra.mxu0 %v1624_v45  ;;  %1777 = vmatpush.msra.mxu1 %v1688_v58  ;;  %v1617_v58 = vld [vmem:[#allocation5 + $0x8] sm:$0xff] }
 0x143   : > { %1795 = vmatpush.msra.mxu2 %v1633_v38  ;;  %1812 = vmatpush.msra.mxu3 %v1709_v39  ;;  %v1622_v38 = vld [vmem:[#allocation5 + $0x30] sm:$0xff] }
 0x144   : > { %1758 = vmatpush.msra.mxu0 %v1620_v49  ;;  %1778 = vmatpush.msra.mxu1 %v1684_v63  ;;  %v1069_v8 = vpop.f32.mrf.mxu2  ;;  %v1089_v16 = vpop.f32.mrf.mxu3  ;;  %v1698_v39 = vld [vmem:[#allocation5 + $0x290] sm:$0xff] }
 0x145   : > { %v1090_v41 = vadd.f32 %v1089_v16, %v1069_v8  ;;  %1796 = vmatpush.msra.mxu2 %v1629_v42  ;;  %1813 = vmatpush.msra.mxu3 %v1705_v43  ;;  %v1734_v8 = vld [vmem:[#allocation5 + $0x3b0] sm:$0xff] }
 0x146   : > { %1759 = vmatpush.msra.mxu0 %v1616_v53  ;;  %1779 = vmatpush.msra.mxu1 %v1680_v4  ;;  %v1621_v53 = vld [vmem:[#allocation5 + $0x28] sm:$0xff]  ;;  %v1662_v4 = vld [vmem:[#allocation5 + $0x170] sm:$0xff] }
 0x147   : > { %v3593_v18 = vpop.f32.mrf.mxu0  ;;  %v3595_v22 = vpop.f32.mrf.mxu1  ;;  %1797 = vmatpush.msra.mxu2 %v1625_v47  ;;  %1814 = vmatpush.msra.mxu3 %v1701_v48  ;;  %v1646_v16 = vld [vmem:[#allocation5 + $0xf0] sm:$0xff]  ;;  %v1679_v47 = vld [vmem:[#allocation5 + $0x1f8] sm:$0xff] }
 0x148   : > { %v1130_v12 = vadd.f32 %v3595_v22, %v3593_v18  ;;  %v1618_v18 = vld [vmem:[#allocation5 + $0x10] sm:$0xff] }
 0x149   : > { %1798 = vmatpush.msra.mxu2 %v1621_v53  ;;  %1815 = vmatpush.msra.mxu3 %v1697_v54  ;;  %v1694_v22 = vld [vmem:[#allocation5 + $0x270] sm:$0xff]  ;;  %v1671_v53 = vld [vmem:[#allocation5 + $0x1b8] sm:$0xff] }
 0x14b   : > { %1799 = vmatpush.msra.mxu2 %v1617_v58  ;;  %1816 = vmatpush.msra.mxu3 %v1693_v59  ;;  %v1739_v58 = vld [vmem:[#allocation5 + $0x3d8] sm:$0xff]  ;;  %v1960_v59 = vld [vmem:[#allocation7 + $0xf0] sm:$0xff] }
 0x14d   : > { %1817 = vmatpush.msra.mxu3 %v1689_v62  ;;  %v1735_v62 = vld [vmem:[#allocation5 + $0x3b8] sm:$0xff] }
 0x14e   : > { %v3597_v25 = vpop.f32.mrf.mxu2  ;;  %v3605_v34 = vpop.f32.mrf.mxu3 }
 0x14f   : > { %1818 = vmatpush.msra.mxu3 %v1685_v3  ;;  %v1727_v3 = vld [vmem:[#allocation5 + $0x378] sm:$0xff] }
 0x151   : > { %1819 = vmatpush.msra.mxu3 %v1681_v6  ;;  %v1723_v6 = vld [vmem:[#allocation5 + $0x358] sm:$0xff] }
 0x161   : > { %v1189_v31 = vpop.f32.mrf.mxu0 }
 0x162   : > { %v1190_v35 = vadd.f32 %v1189_v31, %v1050_v29 }
 0x164   : > { %v1209_v37 = vpop.f32.mrf.mxu1 }
 0x165   : > { %v1210_v40 = vadd.f32 %v1209_v37, %v1190_v35  ;;  %v1702_v35 = vld [vmem:[#allocation5 + $0x2b0] sm:$0xff] }
 0x167   : > { %v1342_v44 = vadd.f32 %v1334_v36, %v1210_v40  ;;  %v1229_v45 = vpop.f32.mrf.mxu2 }
 0x168   : > { %v1230_v46 = vadd.f32 %v1229_v45, %v1090_v41  ;;  %v1170_v41 = vadd.f32 %v3605_v34, %v3597_v25  ;;  %v1675_v25 = vld [vmem:[#allocation5 + $0x1d8] sm:$0xff]  ;;  %v1682_v34 = vld [vmem:[#allocation5 + $0x210] sm:$0xff] }
 0x169   : > { %v1350_v49 = vmul.f32 0.01, %v1342_v44  ;;  %vm1346_vm5 = vcmp.gt.f32.partialorder %v1342_v44, 0.0 }
 0x16a   : > { %v1249_v51 = vpop.f32.mrf.mxu3 }
 0x16b   : > { %v1250_v55 = vadd.f32 %v1249_v51, %v1230_v46  ;;  %v1354_v56 = vsel %vm1346_vm5, %v1342_v44, %v1350_v49  ;;  %v1690_v44 = vld [vmem:[#allocation5 + $0x250] sm:$0xff]  ;;  %v1337_v46 = vperm.slane %v3603_v30, 3  ;;  %v1667_v30 = vld [vmem:[#allocation5 + $0x198] sm:$0xff] }
 0x16c   : > { %1442 = vmatmul.f32.vlgmr.msrb.gmra.mxu0 %v1354_v56 }
 0x16d   : > { %v1343_v60 = vadd.f32 %v1335_v50, %v1250_v55  ;;  %1824 = vmatpush.msrb.mxu0 %v1678_v52  ;;  %v1686_v50 = vld [vmem:[#allocation5 + $0x230] sm:$0xff]  ;;  %v1743_v55 = vld [vmem:[#allocation5 + $0x3f8] sm:$0xff] }
 0x16f   : > { %v1351_v63 = vmul.f32 0.01, %v1343_v60  ;;  %1825 = vmatpush.msrb.mxu0 %v1674_v57  ;;  %vm1347_vm6 = vcmp.gt.f32.partialorder %v1343_v60, 0.0  ;;  %v1663_v57 = vld [vmem:[#allocation5 + $0x178] sm:$0xff] }
 0x171   : > { %1826 = vmatpush.msrb.mxu0 %v1670_v61  ;;  %v1355_v2 = vsel %vm1347_vm6, %v1343_v60, %v1351_v63  ;;  %v1659_v60 = vld [vmem:[#allocation5 + $0x158] sm:$0xff]  ;;  %v1958_v61 = vld [vmem:[#allocation7 + $0xe0] sm:$0xff] }
 0x172   : > { %1462 = vmatmul.f32.vlgmr.msrb.gmra.mxu1 %v1355_v2  ;;  %v1655_v63 = vld [vmem:[#allocation5 + $0x138] sm:$0xff] }
 0x173   : > { %1827 = vmatpush.msrb.mxu0 %v1666_v0  ;;  %1844 = vmatpush.msrb.mxu1 %v1742_v1  ;;  %v1956_v0 = vld [vmem:[#allocation7 + $0xd0] sm:$0xff]  ;;  %v1731_v1 = vld [vmem:[#allocation5 + $0x398] sm:$0xff] }
 0x174   : > { %1760 = vmatmul.f32.vlgmr.msra.gmra.mxu0 %v3185_v23  ;;  %v1651_v2 = vld [vmem:[#allocation5 + $0x118] sm:$0xff] }
 0x175   : > { %1828 = vmatpush.msrb.mxu0 %v1662_v4  ;;  %1845 = vmatpush.msrb.mxu1 %v1738_v5  ;;  %v1954_v4 = vld [vmem:[#allocation7 + $0xc0] sm:$0xff]  ;;  %v1647_v5 = vld [vmem:[#allocation5 + $0xf8] sm:$0xff] }
 0x177   : > { %1829 = vmatpush.msrb.mxu0 %v1658_v7  ;;  %1846 = vmatpush.msrb.mxu1 %v1734_v8  ;;  %v1952_v7 = vld [vmem:[#allocation7 + $0xb0] sm:$0xff]  ;;  %v1643_v8 = vld [vmem:[#allocation5 + $0xd8] sm:$0xff] }
 0x179   : > { %1830 = vmatpush.msrb.mxu0 %v1654_v9  ;;  %1847 = vmatpush.msrb.mxu1 %v1730_v13  ;;  %v1719_v9 = vld [vmem:[#allocation5 + $0x338] sm:$0xff]  ;;  %v1950_v13 = vld [vmem:[#allocation7 + $0xa0] sm:$0xff] }
 0x17a   : > { %1780 = vmatmul.f32.vlgmr.msra.gmra.mxu1 %v3199_v26 }
 0x17b   : > { %1831 = vmatpush.msrb.mxu0 %v1650_v14  ;;  %1848 = vmatpush.msrb.mxu1 %v1726_v15  ;;  %v1639_v14 = vld [vmem:[#allocation5 + $0xb8] sm:$0xff] }
 0x17c   : > { %v1715_v15 = vld [vmem:[#allocation5 + $0x318] sm:$0xff] }
 0x17d   : > { %1832 = vmatpush.msrb.mxu0 %v1646_v16  ;;  %1849 = vmatpush.msrb.mxu1 %v1722_v17  ;;  %v1948_v16 = vld [vmem:[#allocation7 + $0x90] sm:$0xff]  ;;  %v1635_v17 = vld [vmem:[#allocation5 + $0x98] sm:$0xff] }
 0x17f   : > { %1833 = vmatpush.msrb.mxu0 %v1642_v11  ;;  %1850 = vmatpush.msrb.mxu1 %v1718_v19  ;;  %v1711_v11 = vld [vmem:[#allocation5 + $0x2f8] sm:$0xff]  ;;  %v1946_v19 = vld [vmem:[#allocation7 + $0x80] sm:$0xff] }
 0x181   : > { %1834 = vmatpush.msrb.mxu0 %v1638_v20  ;;  %1851 = vmatpush.msrb.mxu1 %v1714_v21  ;;  %v1631_v20 = vld [vmem:[#allocation5 + $0x78] sm:$0xff] }
 0x182   : > { %v1707_v21 = vld [vmem:[#allocation5 + $0x2d8] sm:$0xff] }
 0x183   : > { %v1269_v29 = vpop.f32.mrf.mxu0  ;;  %1835 = vmatpush.msrb.mxu0 %v1634_v24  ;;  %1852 = vmatpush.msrb.mxu1 %v1710_v10  ;;  %v1289_v36 = vpop.f32.mrf.mxu1  ;;  %v1944_v24 = vld [vmem:[#allocation7 + $0x70] sm:$0xff]  ;;  %v1627_v10 = vld [vmem:[#allocation5 + $0x58] sm:$0xff] }
 0x184   : > { %v1270_v31 = vadd.f32 %v1269_v29, %v1130_v12  ;;  %v1703_v12 = vld [vmem:[#allocation5 + $0x2b8] sm:$0xff] }
 0x185   : > { %1836 = vmatpush.msrb.mxu0 %v1630_v27  ;;  %1853 = vmatpush.msrb.mxu1 %v1706_v28  ;;  %v1942_v27 = vld [vmem:[#allocation7 + $0x60] sm:$0xff]  ;;  %v1623_v28 = vld [vmem:[#allocation5 + $0x38] sm:$0xff] }
 0x186   : > { %v1290_v37 = vadd.f32 %v1289_v36, %v1270_v31  ;;  %v1699_v29 = vld [vmem:[#allocation5 + $0x298] sm:$0xff]  ;;  %v1940_v31 = vld [vmem:[#allocation7 + $0x50] sm:$0xff] }
 0x187   : > { %1837 = vmatpush.msrb.mxu0 %v1626_v33  ;;  %1854 = vmatpush.msrb.mxu1 %v1702_v35  ;;  %v1695_v33 = vld [vmem:[#allocation5 + $0x278] sm:$0xff]  ;;  %v1938_v35 = vld [vmem:[#allocation7 + $0x40] sm:$0xff]  ;;  %v2024_v36 = vld [vmem:[#allocation7 + $0x2f0] sm:$0xff] }
 0x188   : > { %v1344_v40 = vadd.f32 %v1336_v32, %v1290_v37  ;;  %v1619_v32 = vld [vmem:[#allocation5 + $0x18] sm:$0xff] }
 0x189   : > { %1838 = vmatpush.msrb.mxu0 %v1622_v38  ;;  %1855 = vmatpush.msrb.mxu1 %v1698_v39  ;;  %v1691_v37 = vld [vmem:[#allocation5 + $0x258] sm:$0xff]  ;;  %v1936_v38 = vld [vmem:[#allocation7 + $0x30] sm:$0xff]  ;;  %v2022_v39 = vld [vmem:[#allocation7 + $0x2e0] sm:$0xff] }
 0x18a   : > { %v1352_v42 = vmul.f32 0.01, %v1344_v40  ;;  %v1309_v43 = vpop.f32.mrf.mxu2  ;;  %vm1348_vm7 = vcmp.gt.f32.partialorder %v1344_v40, 0.0  ;;  %v1329_v48 = vpop.f32.mrf.mxu3 }
 0x18b   : > { %v1310_v45 = vadd.f32 %v1309_v43, %v1170_v41  ;;  %1839 = vmatpush.msrb.mxu0 %v1618_v18  ;;  %1856 = vmatpush.msrb.mxu1 %v1694_v22  ;;  %v1934_v18 = vld [vmem:[#allocation7 + $0x20] sm:$0xff]  ;;  %v2020_v22 = vld [vmem:[#allocation7 + $0x2d0] sm:$0xff]  ;;  %v1683_v41 = vld [vmem:[#allocation5 + $0x218] sm:$0xff] }
 0x18c   : > { %v1356_v49 = vsel %vm1348_vm7, %v1344_v40, %v1352_v42  ;;  %1840 = vmatmul.f32.vlgmr.msrb.gmra.mxu0 %v3185_v23  ;;  %v1687_v40 = vld [vmem:[#allocation5 + $0x238] sm:$0xff]  ;;  %v1932_v42 = vld [vmem:[#allocation7 + $0x10] sm:$0xff]  ;;  %v2018_v43 = vld [vmem:[#allocation7 + $0x2c0] sm:$0xff] }
 0x18d   : > { %v1330_v51 = vadd.f32 %v1329_v48, %v1310_v45  ;;  %1482 = vmatmul.f32.vlgmr.msrb.gmra.mxu2 %v1356_v49  ;;  %1857 = vmatpush.msrb.mxu1 %v1690_v44  ;;  %v1930_v44 = vld [vmem:[#allocation7] sm:$0xff]  ;;  %v1961_v45 = vld [vmem:[#allocation7 + $0xf8] sm:$0xff] }
 0x18e   : > { %1864 = vmatpush.msrb.mxu2 %v1679_v47  ;;  %2064 = vmatpush.msra.mxu0 %v1960_v59  ;;  %v1990_v59 = vld [vmem:[#allocation7 + $0x1e0] sm:$0xff] }
 0x18f   : > { %v1345_v52 = vadd.f32 %v1337_v46, %v1330_v51  ;;  %1858 = vmatpush.msrb.mxu1 %v1686_v50  ;;  %v3626_v46 = vld [vmem:[%s3788_s11 + $0x8] sm:$0xff] }
 0x190   : > { %1865 = vmatpush.msrb.mxu2 %v1675_v25  ;;  %2065 = vmatpush.msra.mxu0 %v1958_v61  ;;  %v1521_v47 = vperm.slane %v3626_v46, 4  ;;  %v1547_v49 = vperm.slane %v3626_v46, 5  ;;  %v1959_v51 = vld [vmem:[#allocation7 + $0xe8] sm:$0xff]  ;;  %v2012_v25 = vld [vmem:[#allocation7 + $0x290] sm:$0xff]  ;;  %v1953_v61 = vld [vmem:[#allocation7 + $0xb8] sm:$0xff] }
 0x191   : > { %v1353_v54 = vmul.f32 0.01, %v1345_v52  ;;  %1859 = vmatpush.msrb.mxu1 %v1682_v34  ;;  %vm1349_vm8 = vcmp.gt.f32.partialorder %v1345_v52, 0.0 }
 0x192   : > { %1866 = vmatpush.msrb.mxu2 %v1671_v53  ;;  %1860 = vmatmul.f32.vlgmr.msrb.gmra.mxu1 %v3199_v26  ;;  %v1529_v50 = vperm.slane %v1521_v47, 0  ;;  %v1555_v34 = vperm.slane %v1547_v49, 1  ;;  %v1992_v53 = vld [vmem:[#allocation7 + $0x1f0] sm:$0xff]  ;;  %v1931_v49 = vld [vmem:[#allocation7 + $0x8] sm:$0xff] }
 0x193   : > { %v1357_v56 = vsel %vm1349_vm8, %v1345_v52, %v1353_v54  ;;  %2066 = vmatpush.msra.mxu0 %v1956_v0  ;;  %v1957_v52 = vld [vmem:[#allocation7 + $0xd8] sm:$0xff]  ;;  %2084 = vmatpush.msra.mxu1 %v1992_v53  ;;  %v2010_v54 = vld [vmem:[#allocation7 + $0x280] sm:$0xff]  ;;  %v1951_v0 = vld [vmem:[#allocation7 + $0xa8] sm:$0xff] }
 0x194   : > { %1502 = vmatmul.f32.vlgmr.msrb.gmra.mxu3 %v1357_v56  ;;  %1867 = vmatpush.msrb.mxu2 %v1667_v30  ;;  %v1955_v30 = vld [vmem:[#allocation7 + $0xc8] sm:$0xff]  ;;  %v1968_v47 = vld [vmem:[#allocation7 + $0x130] sm:$0xff] }
 0x195   : > { %1884 = vmatpush.msrb.mxu3 %v1743_v55  ;;  %1800 = vmatmul.f32.vlgmr.msra.gmra.mxu2 %v3185_v23  ;;  %v2015_v53 = vld [vmem:[#allocation7 + $0x2a8] sm:$0xff] }
 0x196   : > { %1868 = vmatpush.msrb.mxu2 %v1663_v57  ;;  %2067 = vmatpush.msra.mxu0 %v1954_v4  ;;  %v1984_v4 = vld [vmem:[#allocation7 + $0x1b0] sm:$0xff] }
 0x197   : > { %1885 = vmatpush.msrb.mxu3 %v1739_v58  ;;  %2085 = vmatpush.msra.mxu1 %v1990_v59  ;;  %v2013_v59 = vld [vmem:[#allocation7 + $0x298] sm:$0xff] }
 0x198   : > { %1869 = vmatpush.msrb.mxu2 %v1659_v60  ;;  %2068 = vmatpush.msra.mxu0 %v1952_v7  ;;  %v2008_v60 = vld [vmem:[#allocation7 + $0x270] sm:$0xff]  ;;  %v3645_v7 = vld [vmem:[%s3788_s11] sm:$0xff] }
 0x199   : > { %1886 = vmatpush.msrb.mxu3 %v1735_v62  ;;  %v1988_v62 = vld [vmem:[#allocation7 + $0x1d0] sm:$0xff] }
 0x19a   : > { %1870 = vmatpush.msrb.mxu2 %v1655_v63  ;;  %2069 = vmatpush.msra.mxu0 %v1950_v13  ;;  %v2006_v63 = vld [vmem:[#allocation7 + $0x260] sm:$0xff]  ;;  %v1945_v13 = vld [vmem:[#allocation7 + $0x78] sm:$0xff] }
 0x19b   : > { %1887 = vmatpush.msrb.mxu3 %v1731_v1  ;;  %2086 = vmatpush.msra.mxu1 %v1988_v62  ;;  %v1986_v1 = vld [vmem:[#allocation7 + $0x1c0] sm:$0xff] }
 0x19c   : > { %1820 = vmatmul.f32.vlgmr.msra.gmra.mxu3 %v3199_v26  ;;  %1871 = vmatpush.msrb.mxu2 %v1651_v2  ;;  %v2004_v2 = vld [vmem:[#allocation7 + $0x250] sm:$0xff] }
 0x19d   : > { %1888 = vmatpush.msrb.mxu3 %v1727_v3  ;;  %2070 = vmatpush.msra.mxu0 %v1948_v16  ;;  %v1949_v3 = vld [vmem:[#allocation7 + $0x98] sm:$0xff]  ;;  %v1943_v16 = vld [vmem:[#allocation7 + $0x68] sm:$0xff] }
 0x19e   : > { %1872 = vmatpush.msrb.mxu2 %v1647_v5  ;;  %v2002_v5 = vld [vmem:[#allocation7 + $0x240] sm:$0xff]  ;;  %2087 = vmatpush.msra.mxu1 %v1986_v1 }
 0x19f   : > { %1889 = vmatpush.msrb.mxu3 %v1723_v6  ;;  %2071 = vmatpush.msra.mxu0 %v1946_v19  ;;  %v3629_v48 = vpop.permute.xlu0 %1513  ;;  %v1947_v6 = vld [vmem:[#allocation7 + $0x88] sm:$0xff]  ;;  %v1941_v19 = vld [vmem:[#allocation7 + $0x58] sm:$0xff] }
 0x1a0   : > { %1873 = vmatpush.msrb.mxu2 %v1643_v8  ;;  %vm1515_vm9 = vcmp.eq.s32.totalorder %v3629_v48, 1  ;;  %2088 = vmatpush.msra.mxu1 %v1984_v4  ;;  %v1982_v8 = vld [vmem:[#allocation7 + $0x1a0] sm:$0xff] }
 0x1a1   : > { %1890 = vmatpush.msrb.mxu3 %v1719_v9  ;;  %2072 = vmatpush.msra.mxu0 %v1944_v24  ;;  %v1533_v55 = vsel %vm1515_vm9, %v1529_v50, 0.0  ;;  %v2000_v9 = vld [vmem:[#allocation7 + $0x230] sm:$0xff]  ;;  %v1544_v24 = vperm.slane %v3645_v7, 1  ;;  %v2017_v50 = vld [vmem:[#allocation7 + $0x2b8] sm:$0xff]  ;;  %v2046_v4 = vld [vmem:[#allocation7 + $0x3a0] sm:$0xff] }
 0x1a2   : > { %1874 = vmatpush.msrb.mxu2 %v1639_v14  ;;  %2089 = vmatpush.msra.mxu1 %v1982_v8  ;;  %v1980_v14 = vld [vmem:[#allocation7 + $0x190] sm:$0xff] }
 0x1a3   : > { %1891 = vmatpush.msrb.mxu3 %v1715_v15  ;;  %2073 = vmatpush.msra.mxu0 %v1942_v27  ;;  %v1998_v15 = vld [vmem:[#allocation7 + $0x220] sm:$0xff]  ;;  %v1939_v27 = vld [vmem:[#allocation7 + $0x48] sm:$0xff] }
 0x1a4   : > { %1875 = vmatpush.msrb.mxu2 %v1635_v17  ;;  %v1978_v17 = vld [vmem:[#allocation7 + $0x180] sm:$0xff]  ;;  %2090 = vmatpush.msra.mxu1 %v1980_v14  ;;  %v1989_v14 = vld [vmem:[#allocation7 + $0x1d8] sm:$0xff] }
 0x1a5   : > { %1892 = vmatpush.msrb.mxu3 %v1711_v11  ;;  %2074 = vmatpush.msra.mxu0 %v1940_v31  ;;  %v1996_v11 = vld [vmem:[#allocation7 + $0x210] sm:$0xff]  ;;  %v1937_v31 = vld [vmem:[#allocation7 + $0x38] sm:$0xff] }
 0x1a6   : > { %1876 = vmatpush.msrb.mxu2 %v1631_v20  ;;  %v1518_v20 = vperm.slane %v3645_v7, 0  ;;  %2091 = vmatpush.msra.mxu1 %v1978_v17  ;;  %v1987_v17 = vld [vmem:[#allocation7 + $0x1c8] sm:$0xff] }
 0x1a7   : > { %1893 = vmatpush.msrb.mxu3 %v1707_v21  ;;  %2075 = vmatpush.msra.mxu0 %v1938_v35  ;;  %v3648_v21 = vpop.permute.xlu1 %1567 }
 0x1a8   : > { %1877 = vmatpush.msrb.mxu2 %v1627_v10  ;;  %v1976_v10 = vld [vmem:[#allocation7 + $0x170] sm:$0xff]  ;;  %v1526_v35 = vperm.slane %v1518_v20, 0  ;;  %vm1569_vm11 = vcmp.eq.s32.totalorder %v3648_v21, 1 }
 0x1a9   : > { %1894 = vmatpush.msrb.mxu3 %v1703_v12  ;;  %2076 = vmatpush.msra.mxu0 %v1936_v38  ;;  %v3635_v56 = vpop.permute.xlu0 %1541  ;;  %v1994_v12 = vld [vmem:[#allocation7 + $0x200] sm:$0xff]  ;;  %v1972_v38 = vld [vmem:[#allocation7 + $0x150] sm:$0xff] }
 0x1aa   : > { %1878 = vmatpush.msrb.mxu2 %v1623_v28  ;;  %vm1543_vm10 = vcmp.eq.s32.totalorder %v3635_v56, 1  ;;  %v2025_v28 = vld [vmem:[#allocation7 + $0x2f8] sm:$0xff]  ;;  %2092 = vmatpush.msra.mxu1 %v1976_v10  ;;  %v1546_v10 = vperm.slane %v3626_v46, 1 }
 0x1ab   : > { %1895 = vmatpush.msrb.mxu3 %v1699_v29  ;;  %2077 = vmatpush.msra.mxu0 %v1934_v18  ;;  %v1559_v57 = vsel %vm1543_vm10, %v1555_v34, 0.0  ;;  %v1974_v29 = vld [vmem:[#allocation7 + $0x160] sm:$0xff]  ;;  %v2021_v18 = vld [vmem:[#allocation7 + $0x2d8] sm:$0xff] }
 0x1ac   : > { %1879 = vmatpush.msrb.mxu2 %v1619_v32  ;;  %v3640_v58 = vadd.f32 %v1559_v57, %v1533_v55  ;;  %v2023_v32 = vld [vmem:[#allocation7 + $0x2e8] sm:$0xff]  ;;  %2093 = vmatpush.msra.mxu1 %v1974_v29  ;;  %v1966_v34 = vld [vmem:[#allocation7 + $0x120] sm:$0xff]  ;;  %v1964_v55 = vld [vmem:[#allocation7 + $0x110] sm:$0xff] }
 0x1ad   : > { %1896 = vmatpush.msrb.mxu3 %v1695_v33  ;;  %1880 = vmatmul.f32.vlgmr.msrb.gmra.mxu2 %v3185_v23  ;;  %v2016_v23 = vld [vmem:[#allocation7 + $0x2b0] sm:$0xff]  ;;  %v2050_v57 = vld [vmem:[#allocation7 + $0x3c0] sm:$0xff]  ;;  %v1985_v29 = vld [vmem:[#allocation7 + $0x1b8] sm:$0xff] }
 0x1ae   : > { %2104 = vmatpush.msra.mxu2 %v2024_v36  ;;  %2078 = vmatpush.msra.mxu0 %v1932_v42  ;;  %v2056_v33 = vld [vmem:[#allocation7 + $0x3f0] sm:$0xff]  ;;  %v1570_v36 = vperm.slane %v3645_v7, 2  ;;  %v2019_v42 = vld [vmem:[#allocation7 + $0x2c8] sm:$0xff] }
 0x1af   : > { %1897 = vmatpush.msrb.mxu3 %v1691_v37  ;;  %v1552_v37 = vperm.slane %v1544_v24, 1  ;;  %2094 = vmatpush.msra.mxu1 %v1972_v38  ;;  %v1520_v24 = vperm.slane %v3626_v46, 0  ;;  %v1572_v38 = vperm.slane %v3626_v46, 2 }
 0x1b0   : > { %2105 = vmatpush.msra.mxu2 %v2022_v39  ;;  %2079 = vmatpush.msra.mxu0 %v1930_v44  ;;  %v2054_v39 = vld [vmem:[#allocation7 + $0x3e0] sm:$0xff]  ;;  %v1578_v44 = vperm.slane %v1570_v36, 2  ;;  %v2001_v36 = vld [vmem:[#allocation7 + $0x238] sm:$0xff] }
 0x1b1   : > { %1898 = vmatpush.msrb.mxu3 %v1687_v40  ;;  %v1935_v40 = vld [vmem:[#allocation7 + $0x28] sm:$0xff] }
 0x1b2   : > { %2106 = vmatpush.msra.mxu2 %v2020_v22  ;;  %2144 = vmatpush.msrb.mxu0 %v1961_v45  ;;  %v1970_v22 = vld [vmem:[#allocation7 + $0x140] sm:$0xff]  ;;  %v1596_v45 = vperm.slane %v3645_v7, 3 }
 0x1b3   : > { %1899 = vmatpush.msrb.mxu3 %v1683_v41  ;;  %v1933_v41 = vld [vmem:[#allocation7 + $0x18] sm:$0xff]  ;;  %2095 = vmatpush.msra.mxu1 %v1970_v22  ;;  %v1999_v22 = vld [vmem:[#allocation7 + $0x228] sm:$0xff] }
 0x1b4   : > { %1900 = vmatmul.f32.vlgmr.msrb.gmra.mxu3 %v3199_v26  ;;  %2107 = vmatpush.msra.mxu2 %v2018_v43  ;;  %v2014_v26 = vld [vmem:[#allocation7 + $0x2a0] sm:$0xff]  ;;  %v1530_v43 = vsel %vm1515_vm9, %v1526_v35, 0.0  ;;  %v1983_v35 = vld [vmem:[#allocation7 + $0x1a8] sm:$0xff] }
 0x1b5   : > { %2145 = vmatpush.msrb.mxu0 %v1959_v51  ;;  %2124 = vmatpush.msra.mxu3 %v2056_v33  ;;  %v3660_v51 = vpop.permute.xlu1 %1593  ;;  %v2038_v33 = vld [vmem:[#allocation7 + $0x360] sm:$0xff] }
 0x1b6   : > { %2108 = vmatpush.msra.mxu2 %v2016_v23  ;;  %v1556_v23 = vsel %vm1543_vm10, %v1552_v37, 0.0  ;;  %2096 = vmatpush.msra.mxu1 %v1968_v47  ;;  %vm1595_vm12 = vcmp.eq.s32.totalorder %v3660_v51, 1  ;;  %v1528_v37 = vperm.slane %v1520_v24, 0  ;;  %v2033_v51 = vld [vmem:[#allocation7 + $0x338] sm:$0xff] }
 0x1b7   : > { %2146 = vmatpush.msrb.mxu0 %v1957_v52  ;;  %2125 = vmatpush.msra.mxu3 %v2054_v39  ;;  %v2052_v52 = vld [vmem:[#allocation7 + $0x3d0] sm:$0xff]  ;;  %v1554_v39 = vperm.slane %v1546_v10, 1 }
 0x1b8   : > { %2109 = vmatpush.msra.mxu2 %v2014_v26  ;;  %2097 = vmatpush.msra.mxu1 %v1966_v34  ;;  %v1532_v47 = vsel %vm1515_vm9, %v1528_v37, 0.0  ;;  %v2032_v34 = vld [vmem:[#allocation7 + $0x330] sm:$0xff] }
 0x1b9   : > { %2147 = vmatpush.msrb.mxu0 %v1955_v30  ;;  %v1604_v30 = vperm.slane %v1596_v45, 3  ;;  %2126 = vmatpush.msra.mxu3 %v2052_v52  ;;  %v1977_v52 = vld [vmem:[#allocation7 + $0x178] sm:$0xff] }
 0x1ba   : > { %2110 = vmatpush.msra.mxu2 %v2012_v25  ;;  %v1560_v25 = vadd.f32 %v1556_v23, %v1530_v43  ;;  %2098 = vmatpush.msra.mxu1 %v1964_v55  ;;  %v1573_v43 = vperm.slane %v3626_v46, 6  ;;  %v1997_v23 = vld [vmem:[#allocation7 + $0x218] sm:$0xff]  ;;  %v2030_v55 = vld [vmem:[#allocation7 + $0x320] sm:$0xff] }
 0x1bb   : > { %2148 = vmatpush.msrb.mxu0 %v1953_v61  ;;  %v2048_v61 = vld [vmem:[#allocation7 + $0x3b0] sm:$0xff]  ;;  %2127 = vmatpush.msra.mxu3 %v2050_v57  ;;  %v1975_v57 = vld [vmem:[#allocation7 + $0x168] sm:$0xff] }
 0x1bc   : > { %2111 = vmatpush.msra.mxu2 %v2010_v54  ;;  %v1582_v54 = vsel %vm1569_vm11, %v1578_v44, 0.0  ;;  %v1979_v44 = vld [vmem:[#allocation7 + $0x188] sm:$0xff] }
 0x1bd   : > { %2149 = vmatpush.msrb.mxu0 %v1951_v0  ;;  %v1586_v62 = vadd.f32 %v1582_v54, %v1560_v25  ;;  %v2011_v0 = vld [vmem:[#allocation7 + $0x288] sm:$0xff]  ;;  %2128 = vmatpush.msra.mxu3 %v2048_v61  ;;  %v1598_v25 = vperm.slane %v3626_v46, 3  ;;  %v1581_v54 = vperm.slane %v1573_v43, 2  ;;  %v2028_v61 = vld [vmem:[#allocation7 + $0x310] sm:$0xff]  ;;  %v2045_v43 = vld [vmem:[#allocation7 + $0x398] sm:$0xff] }
 0x1be   : > { %2112 = vmatpush.msra.mxu2 %v2008_v60  ;;  %v1962_v60 = vld [vmem:[#allocation7 + $0x100] sm:$0xff] }
 0x1bf   : > { %2150 = vmatpush.msrb.mxu0 %v1949_v3  ;;  %2099 = vmatpush.msra.mxu1 %v1962_v60  ;;  %v1606_v60 = vperm.slane %v1598_v25, 3 }
 0x1c0   : > { %2113 = vmatpush.msra.mxu2 %v2006_v63  ;;  %v1993_v63 = vld [vmem:[#allocation7 + $0x1f8] sm:$0xff]  ;;  %2129 = vmatpush.msra.mxu3 %v2046_v4  ;;  %v1519_v4 = vperm.slane %v3645_v7, 4 }
 0x1c1   : > { %2151 = vmatpush.msrb.mxu0 %v1947_v6  ;;  %2164 = vmatpush.msrb.mxu1 %v1993_v63  ;;  %v2009_v6 = vld [vmem:[#allocation7 + $0x278] sm:$0xff]  ;;  %v2026_v63 = vld [vmem:[#allocation7 + $0x300] sm:$0xff] }
 0x1c2   : > { %2114 = vmatpush.msra.mxu2 %v2004_v2  ;;  %v1608_v2 = vsel %vm1595_vm12, %v1604_v30, 0.0  ;;  %v1527_v10 = vperm.slane %v1519_v4, 0 }
 0x1c3   : > { %2152 = vmatpush.msrb.mxu0 %v1945_v13  ;;  %v1612_v3 = vadd.f32 %v1608_v2, %v1586_v62  ;;  %v2044_v13 = vld [vmem:[#allocation7 + $0x390] sm:$0xff]  ;;  %v1973_v62 = vld [vmem:[#allocation7 + $0x158] sm:$0xff]  ;;  %v1971_v2 = vld [vmem:[#allocation7 + $0x148] sm:$0xff] }
 0x1c4   : > { %2115 = vmatpush.msra.mxu2 %v2002_v5  ;;  %v1991_v5 = vld [vmem:[#allocation7 + $0x1e8] sm:$0xff]  ;;  %2130 = vmatpush.msra.mxu3 %v2044_v13  ;;  %v2057_v13 = vld [vmem:[#allocation7 + $0x3f8] sm:$0xff] }
 0x1c5   : > { %2153 = vmatpush.msrb.mxu0 %v1943_v16  ;;  %2165 = vmatpush.msrb.mxu1 %v1991_v5  ;;  %v2042_v16 = vld [vmem:[#allocation7 + $0x380] sm:$0xff] }
 0x1c6   : > { %2116 = vmatpush.msra.mxu2 %v2000_v9  ;;  %v3672_v9 = vld [vmem:[%s3789_s12] sm:$0xf]  ;;  %2131 = vmatpush.msra.mxu3 %v2042_v16 }
 0x1c7   : > { %2154 = vmatpush.msrb.mxu0 %v1941_v19  ;;  %2166 = vmatpush.msrb.mxu1 %v1989_v14  ;;  %v1906_v20 = vperm.slane %v3672_v9, 0  ;;  %v1969_v14 = vld [vmem:[#allocation7 + $0x138] sm:$0xff] }
 0x1c8   : > { %2117 = vmatpush.msra.mxu2 %v1998_v15  ;;  %v2007_v15 = vld [vmem:[#allocation7 + $0x268] sm:$0xff] }
 0x1c9   : > { %2155 = vmatpush.msrb.mxu0 %v1939_v27  ;;  %2167 = vmatpush.msrb.mxu1 %v1987_v17 }
 0x1ca   : > { %2118 = vmatpush.msra.mxu2 %v1996_v11  ;;  %v2005_v11 = vld [vmem:[#allocation7 + $0x258] sm:$0xff] }
 0x1cb   : > { %2156 = vmatpush.msrb.mxu0 %v1937_v31  ;;  %v2003_v31 = vld [vmem:[#allocation7 + $0x248] sm:$0xff]  ;;  %2168 = vmatpush.msrb.mxu1 %v1985_v29  ;;  %v1965_v29 = vld [vmem:[#allocation7 + $0x118] sm:$0xff] }
 0x1cc   : > { %2119 = vmatpush.msra.mxu2 %v1994_v12 }
 0x1cd   : > { %2157 = vmatpush.msrb.mxu0 %v1935_v40  ;;  %2169 = vmatpush.msrb.mxu1 %v1983_v35  ;;  %v2036_v40 = vld [vmem:[#allocation7 + $0x350] sm:$0xff]  ;;  %v1908_v35 = vperm.slane %v3672_v9, 2 }
 0x1ce   : > { %2184 = vmatpush.msrb.mxu2 %v2025_v28  ;;  %v2040_v28 = vld [vmem:[#allocation7 + $0x370] sm:$0xff] }
 0x1cf   : > { %2158 = vmatpush.msrb.mxu0 %v1933_v41  ;;  %2132 = vmatpush.msra.mxu3 %v2040_v28 }
 0x1d0   : > { %2185 = vmatpush.msrb.mxu2 %v2023_v32 }
 0x1d1   : > { %2159 = vmatpush.msrb.mxu0 %v1931_v49  ;;  %2133 = vmatpush.msra.mxu3 %v2038_v33  ;;  %v1580_v49 = vperm.slane %v1572_v38, 2 }
 0x1d2   : > { %2186 = vmatpush.msrb.mxu2 %v2021_v18  ;;  %v1981_v18 = vld [vmem:[#allocation7 + $0x198] sm:$0xff] }
 0x1d3   : > { %2134 = vmatpush.msra.mxu3 %v2036_v40  ;;  %2170 = vmatpush.msrb.mxu1 %v1981_v18  ;;  %v1597_v40 = vperm.slane %v3645_v7, 7  ;;  %v2049_v18 = vld [vmem:[#allocation7 + $0x3b8] sm:$0xff] }
 0x1d4   : > { %2187 = vmatpush.msrb.mxu2 %v2019_v42  ;;  %v2034_v42 = vld [vmem:[#allocation7 + $0x340] sm:$0xff] }
 0x1d5   : > { %2135 = vmatpush.msra.mxu3 %v2034_v42  ;;  %2171 = vmatpush.msrb.mxu1 %v1979_v44  ;;  %v2047_v42 = vld [vmem:[#allocation7 + $0x3a8] sm:$0xff] }
 0x1d6   : > { %2188 = vmatpush.msrb.mxu2 %v2017_v50  ;;  %v1558_v50 = vsel %vm1543_vm10, %v1554_v39, 0.0 }
 0x1d7   : > { %2136 = vmatpush.msra.mxu3 %v2032_v34  ;;  %v1562_v30 = vadd.f32 %v1558_v50, %v1532_v47  ;;  %2172 = vmatpush.msrb.mxu1 %v1977_v52  ;;  %v2043_v47 = vld [vmem:[#allocation7 + $0x388] sm:$0xff]  ;;  %v2041_v52 = vld [vmem:[#allocation7 + $0x378] sm:$0xff] }
 0x1d8   : > { %2189 = vmatpush.msrb.mxu2 %v2015_v53  ;;  %v1995_v53 = vld [vmem:[#allocation7 + $0x208] sm:$0xff] }
 0x1d9   : > { %2137 = vmatpush.msra.mxu3 %v2030_v55  ;;  %2173 = vmatpush.msrb.mxu1 %v1975_v57  ;;  %v2037_v55 = vld [vmem:[#allocation7 + $0x358] sm:$0xff]  ;;  %v2035_v57 = vld [vmem:[#allocation7 + $0x348] sm:$0xff] }
 0x1da   : > { %2190 = vmatpush.msrb.mxu2 %v2013_v59  ;;  %v1584_v59 = vsel %vm1569_vm11, %v1580_v49, 0.0 }
 0x1db   : > { %2138 = vmatpush.msra.mxu3 %v2028_v61  ;;  %v1588_v5 = vadd.f32 %v1584_v59, %v1562_v30  ;;  %2174 = vmatpush.msrb.mxu1 %v1973_v62  ;;  %v2031_v62 = vld [vmem:[#allocation7 + $0x328] sm:$0xff] }
 0x1dc   : > { %2191 = vmatpush.msrb.mxu2 %v2011_v0  ;;  %v1585_v0 = vsel %vm1569_vm11, %v1581_v54, 0.0 }
 0x1dd   : > { %2139 = vmatpush.msra.mxu3 %v2026_v63  ;;  %2175 = vmatpush.msrb.mxu1 %v1971_v2  ;;  %v1589_v17 = vadd.f32 %v1585_v0, %v3640_v58  ;;  %v1963_v58 = vld [vmem:[#allocation7 + $0x108] sm:$0xff]  ;;  %v2029_v0 = vld [vmem:[#allocation7 + $0x318] sm:$0xff] }
 0x1de   : > { %2192 = vmatpush.msrb.mxu2 %v2009_v6  ;;  %v1545_v6 = vperm.slane %v3645_v7, 5 }
 0x1df   : > { %2204 = vmatpush.msrb.mxu3 %v2057_v13  ;;  %2176 = vmatpush.msrb.mxu1 %v1969_v14  ;;  %v1909_v13 = vperm.slane %v3672_v9, 3 }
 0x1e0   : > { %2193 = vmatpush.msrb.mxu2 %v2007_v15  ;;  %v2055_v15 = vld [vmem:[#allocation7 + $0x3e8] sm:$0xff] }
 0x1e1   : > { %2205 = vmatpush.msrb.mxu3 %v2055_v15 }
 0x1e2   : > { %2194 = vmatpush.msrb.mxu2 %v2005_v11  ;;  %v2053_v11 = vld [vmem:[#allocation7 + $0x3d8] sm:$0xff] }
 0x1e3   : > { %2206 = vmatpush.msrb.mxu3 %v2053_v11 }
 0x1e4   : > { %2195 = vmatpush.msrb.mxu2 %v2003_v31  ;;  %v2051_v31 = vld [vmem:[#allocation7 + $0x3c8] sm:$0xff] }
 0x1e5   : > { %2207 = vmatpush.msrb.mxu3 %v2051_v31 }
 0x1e6   : > { %2196 = vmatpush.msrb.mxu2 %v2001_v36  ;;  %v1531_v36 = vsel %vm1515_vm9, %v1527_v10, 0.0 }
 0x1e7   : > { %2208 = vmatpush.msrb.mxu3 %v2049_v18 }
 0x1e8   : > { %2197 = vmatpush.msrb.mxu2 %v1999_v22 }
 0x1e9   : > { %v3658_v26 = vpop.f32.mrf.mxu0  ;;  %2209 = vmatpush.msrb.mxu3 %v2047_v42 }
 0x1ea   : > { %2198 = vmatpush.msrb.mxu2 %v1997_v23 }
 0x1eb   : > { %2210 = vmatpush.msrb.mxu3 %v2045_v43 }
 0x1ec   : > { %2199 = vmatpush.msrb.mxu2 %v1995_v53 }
 0x1ed   : > { %2211 = vmatpush.msrb.mxu3 %v2043_v47 }
 0x1ef   : > { %v3665_v1 = vpop.f32.mrf.mxu1  ;;  %2212 = vmatpush.msrb.mxu3 %v2041_v52 }
 0x1f1   : > { %v1761_v8 = vpop.f32.mrf.mxu0 }
 0x1f2   : > { %v1762_v19 = vadd.f32 %v1761_v8, %v1612_v3  ;;  %v1599_v3 = vperm.slane %v3626_v46, 7  ;;  %v1610_v8 = vsel %vm1595_vm12, %v1606_v60, 0.0  ;;  %v1967_v46 = vld [vmem:[#allocation7 + $0x128] sm:$0xff]  ;;  %v1907_v60 = vperm.slane %v3672_v9, 1 }
 0x1f3   : > { %2177 = vmatpush.msrb.mxu1 %v1967_v46 }
 0x1f4   : > { %v1607_v16 = vperm.slane %v1599_v3, 3  ;;  %v2027_v3 = vld [vmem:[#allocation7 + $0x308] sm:$0xff] }
 0x1f5   : > { %2178 = vmatpush.msrb.mxu1 %v1965_v29 }
 0x1f7   : > { %v1781_v12 = vpop.f32.mrf.mxu1  ;;  %2179 = vmatpush.msrb.mxu1 %v1963_v58 }
 0x1f8   : > { %v1782_v27 = vadd.f32 %v1781_v12, %v1762_v19  ;;  %v1611_v19 = vsel %vm1595_vm12, %v1607_v16, 0.0  ;;  %v1571_v12 = vperm.slane %v3645_v7, 6 }
 0x1f9   : > { %v3696_v24 = vadd.f32 %v1611_v19, %v1589_v17 }
 0x1fa   : > { %v1914_v32 = vadd.f32 %v1906_v20, %v1782_v27  ;;  %v1614_v20 = vadd.f32 %v1610_v8, %v1588_v5  ;;  %v1553_v27 = vperm.slane %v1545_v6, 1  ;;  %v1579_v37 = vperm.slane %v1571_v12, 2 }
 0x1fc   : > { %v1922_v41 = vmul.f32 0.01, %v1914_v32  ;;  %vm1918_vm13 = vcmp.gt.f32.partialorder %v1914_v32, 0.0  ;;  %v1557_v38 = vsel %vm1543_vm10, %v1553_v27, 0.0  ;;  %v1583_v56 = vsel %vm1569_vm11, %v1579_v37, 0.0 }
 0x1fd   : > { %v1561_v44 = vadd.f32 %v1557_v38, %v1531_v36 }
 0x1fe   : > { %v1926_v45 = vsel %vm1918_vm13, %v1914_v32, %v1922_v41  ;;  %v2555_v32 = vld [vmem:[%s3786_s9] ss:$0 sm:$0xff] }
 0x1ff   : > { %2080 = vmatmul.f32.vlgmr.msra.gmra.mxu0 %v1926_v45  ;;  %v1444_v23 = vadd.f32 %v2555_v32, %v3658_v26  ;;  %v1587_v25 = vadd.f32 %v1583_v56, %v1561_v44 }
 0x201   : > { %v1464_v7 = vadd.f32 %v3665_v1, %v1444_v23  ;;  %v2039_v1 = vld [vmem:[#allocation7 + $0x368] sm:$0xff] }
 0x202   : > { %2213 = vmatpush.msrb.mxu3 %v2039_v1 }
 0x204   : > { %2214 = vmatpush.msrb.mxu3 %v2037_v55 }
 0x206   : > { %2215 = vmatpush.msrb.mxu3 %v2035_v57 }
 0x207   : > { %2160 = vmatmul.f32.vlgmr.msrb.gmra.mxu0 %v1926_v45  ;;  %v1605_v45 = vperm.slane %v1597_v40, 3 }
 0x208   : > { %2216 = vmatpush.msrb.mxu3 %v2033_v51 }
 0x209   : > { %v1841_v28 = vpop.f32.mrf.mxu0  ;;  %v1609_v21 = vsel %vm1595_vm12, %v1605_v45, 0.0 }
 0x20a   : > { %v1842_v33 = vadd.f32 %v1841_v28, %v1614_v20  ;;  %v1613_v54 = vadd.f32 %v1609_v21, %v1587_v25  ;;  %2217 = vmatpush.msrb.mxu3 %v2031_v62 }
 0x20c   : > { %2218 = vmatpush.msrb.mxu3 %v2029_v0 }
 0x20e   : > { %2219 = vmatpush.msrb.mxu3 %v2027_v3 }
 0x20f   : > { %v1861_v39 = vpop.f32.mrf.mxu1 }
 0x210   : > { %v1862_v22 = vadd.f32 %v1861_v39, %v1842_v33  ;;  %v1483_v41 = vpop.f32.mrf.mxu2 }
 0x211   : > { %v1484_v50 = vadd.f32 %v1483_v41, %v1464_v7 }
 0x212   : > { %v1916_v48 = vadd.f32 %v1908_v35, %v1862_v22 }
 0x214   : > { %v1924_v49 = vmul.f32 0.01, %v1916_v48  ;;  %vm1920_vm14 = vcmp.gt.f32.partialorder %v1916_v48, 0.0 }
 0x216   : > { %v1928_v34 = vsel %vm1920_vm14, %v1916_v48, %v1924_v49 }
 0x217   : > { %v1503_v26 = vpop.f32.mrf.mxu3  ;;  %2120 = vmatmul.f32.vlgmr.msra.gmra.mxu2 %v1928_v34 }
 0x218   : > { %v1504_v53 = vadd.f32 %v1503_v26, %v1484_v50  ;;  %v1801_v30 = vpop.f32.mrf.mxu2 }
 0x219   : > { %v1802_v59 = vadd.f32 %v1801_v30, %v1613_v54 }
 0x21a   : > { %1506 = vst [vmem:[%s648_s16] sm:$0xff] %v1504_v53 }
 0x21f   : > { %v1821_v61 = vpop.f32.mrf.mxu3  ;;  %2200 = vmatmul.f32.vlgmr.msrb.gmra.mxu2 %v1928_v34 }
 0x220   : > { %v1822_v63 = vadd.f32 %v1821_v61, %v1802_v59 }
 0x222   : > { %v1915_v2 = vadd.f32 %v1907_v60, %v1822_v63 }
 0x224   : > { %v1923_v4 = vmul.f32 0.01, %v1915_v2  ;;  %vm1919_vm15 = vcmp.gt.f32.partialorder %v1915_v2, 0.0 }
 0x226   : > { %v1927_v5 = vsel %vm1919_vm15, %v1915_v2, %v1923_v4 }
 0x227   : > { %2100 = vmatmul.f32.vlgmr.msra.gmra.mxu1 %v1927_v5 }
 0x22f   : > { %2180 = vmatmul.f32.vlgmr.msrb.gmra.mxu1 %v1927_v5 }
 0x230   : > { %v1881_v6 = vpop.f32.mrf.mxu2 }
 0x231   : > { %v1882_v8 = vadd.f32 %v1881_v6, %v3696_v24 }
 0x237   : > { %v1901_v14 = vpop.f32.mrf.mxu3 }
 0x238   : > { %v1902_v15 = vadd.f32 %v1901_v14, %v1882_v8 }
 0x23a   : > { %v1917_v16 = vadd.f32 %v1909_v13, %v1902_v15 }
 0x23c   : > { %v1925_v17 = vmul.f32 0.01, %v1917_v16  ;;  %vm1921_vm0 = vcmp.gt.f32.partialorder %v1917_v16, 0.0 }
 0x23e   : > { %v1929_v46 = vsel %vm1921_vm0, %v1917_v16, %v1925_v17 }
 0x23f   : > { %2140 = vmatmul.f32.vlgmr.msra.gmra.mxu3 %v1929_v46 }
 0x247   : > { %2220 = vmatmul.f32.vlgmr.msrb.gmra.mxu3 %v1929_v46 }
 0x248   : > { %2673 = shalt.err (!%p2670_p8)
}
 0x249   : > { %2486 = dma.vmem_to_hbm [thread:$0]  (%p2886_p5), %s2270_s19, 256, %s2272_s21, %s2238_s29  }
 0x24a   : > { %s3823_s26 = sld [smem:[#allocation25_spill]]  ;;  %s3824_s18 = sshll.u32 %s2980_s30, 4 }
 0x24b   : > { %s625_s27 = scalar_lea.vmem [#allocation8], %s3824_s18  ;;  %s3825_s29 = sld [smem:[#allocation26_spill]] }
 0x24c   : > { %s2254_s23 = sshll.u32 %s625_s27, 4  ;;  %s2233_s10 = scalar_lea.sflag [#allocation4], %s2980_s30  ;;  %s2255_s23 = int_to_ptr.vmem [resolvable:$true] %s2254_s23 }
 0x250   : > { %v2058_v9 = vld [vmem:[%s3823_s26] sm:$0x3] }
 0x251   : > { %v2060_v19 = vperm.slane %v2058_v9, 0  ;;  %v2061_v27 = vperm.slane %v2058_v9, 1  ;;  %s2252_s22 = scalar_lea.hbm %s3825_s29, %s2471_s6  ;;  %s2694_s6 = scalar_lea.hbm %s3825_s29, 48 }
 0x252   : > { %s2256_s0 = sshll.u32 %s2252_s22, 4  ;;  %s2257_s0 = int_to_ptr.hbm [resolvable:$true] %s2256_s0 }
 0x253   : > { %s2688_s14 = sshra.s32 %s2257_s0, 4  ;;  %s2689_s14 = int_to_ptr.hbm [resolvable:$true] %s2688_s14 }
 0x254   : > { %s2690_s16 = scalar_lea.hbm %s2689_s14, 16  ;;  %p2695_p12 = scmp.lt.s32.totalorder %s2689_s14, %s3825_s29 }
 0x255   : > { %p2691_p9 = scmp.ne.s32.totalorder %s2689_s14, %s2690_s16  ;;  %p2696_p13 = scmp.lt.s32.totalorder %s2694_s6, %s2690_s16 }
 0x257   : > { %p2692_p10 = pnand %p2691_p9, %p2886_p5  ;;  %p2697_p0 = por %p2696_p13, %p2695_p12 }
 0x259   : > { %p2693_p11 = pneg %p2692_p10 }
 0x25b   : > { %p2698_p1 = pnand %p2697_p0, %p2693_p11 }
 0x27c   : > { %v2081_v11 = vpop.f32.mrf.mxu0 }
 0x27d   : > { %v2082_v24 = vadd.f32 %v2081_v11, %v2060_v19 }
 0x284   : > { %v2161_v28 = vpop.f32.mrf.mxu0 }
 0x285   : > { %v2162_v32 = vadd.f32 %v2161_v28, %v2061_v27 }
 0x29a   : > { %v2121_v12 = vpop.f32.mrf.mxu2 }
 0x2a2   : > { %v2201_v36 = vpop.f32.mrf.mxu2 }
 0x2a4   : > { %v2101_v20 = vpop.f32.mrf.mxu1 }
 0x2a5   : > { %v2102_v10 = vadd.f32 %v2101_v20, %v2082_v24 }
 0x2a7   : > { %v2122_v29 = vadd.f32 %v2121_v12, %v2102_v10 }
 0x2ac   : > { %v2181_v31 = vpop.f32.mrf.mxu1 }
 0x2ad   : > { %v2182_v35 = vadd.f32 %v2181_v31, %v2162_v32 }
 0x2af   : > { %v2202_v37 = vadd.f32 %v2201_v36, %v2182_v35 }
 0x2c2   : > { %v2141_v58 = vpop.f32.mrf.mxu3 }
 0x2c3   : > { %v2142_v33 = vadd.f32 %v2141_v58, %v2122_v29 }
 0x2c5   : > { %2224 = vst [vmem:[%s625_s27] sm:$0xff] %v2142_v33 }
 0x2ca   : > { %v2221_v38 = vpop.f32.mrf.mxu3 }
 0x2cb   : > { %v2222_v39 = vadd.f32 %v2221_v38, %v2202_v37 }
 0x2cd   : > { %2225 = vst [vmem:[%s625_s27 + $0x8] sm:$0xff] %v2222_v39 }
 0x2ce   : > { %2701 = shalt.err (!%p2698_p1)
}
 0x2cf   : > { %2485 = dma.vmem_to_hbm [thread:$0]  (%p2886_p5), %s2255_s23, 256, %s2257_s0, %s2233_s10  }
 0x2d0 PF: > { %s3826_s30 = sld [smem:[#allocation17_spill]] }
 0x2d1   : > { %s3827_s18 = sld [smem:[#allocation15_spill]] }
 0x2d6   : > { %p2512_p2 = scmp.ge.s32.totalorder %s3826_s30, 2 }
 0x2d7   : > { %s2290_s19 = sand.u32 1, %s3827_s18  }
 0x2d8   : > { %p2500_p3 = pnand %p2512_p2, %p2890_p6  ;;  %s2291_s21 = scalar_lea.sflag [#allocation4], %s2290_s19 }
 0x2da   : > { %p2501_p4 = pneg %p2500_p3 }
 0x2dc   : > { %2727 = dma.done.wait (%p2501_p4), %s2291_s21, 256  }
 0x2dd   : > { %2729 = vsyncadd (%p2501_p4), %s2291_s21, 4294967040  ;;  %s2301_s22 = scalar_lea.sflag [#allocation10], %s2290_s19 }
 0x2de   : > { %2731 = dma.done.wait (%p2501_p4), %s2301_s22, 256  }
 0x2df   : > { %2733 = vsyncadd (%p2501_p4), %s2301_s22, 4294967040  ;;  %s3829_s27 = sld [smem:[#allocation18_spill]]  ;;  %s3832_s24 = smov %s2740_s25 }
 0x2e0   : > { %s3830_s14 = sld [smem:[#allocation16_spill]] }
 0x2e1   : > { %s3831_s26 = sld [smem:[#allocation19_spill]] }
 0x2e5   : > { %p33_p5 = scmp.ge.s32.totalorder %s3829_s27, 5  }
 0x2e6   : > { %s3833_s25 = smov %s3830_s14 }
 0x2e7   :  { %35 = sbr.rel (!%p33_p5) target bundleno = 14 (0xe), region = 163 }
 0x2ec   :  { %2307 = vsyncpa [#allocation3], 1 }
 0x2ed   :  { %2309 = vsyncpa [#allocation3 + $0x1], 1 }
 0x2ee   :  { %2310 = vsyncpa [#allocation6], 1 }
 0x2ef   :  { %2311 = vsyncpa [#allocation4], 1 }
 0x2f0   :  { %2313 = vsyncpa [#allocation4 + $0x1], 1 }
 0x2f1   :  { %2314 = vsyncpa [#allocation10], 1 }
 0x2f2   :  { %2316 = vsyncpa [#allocation10 + $0x1], 1 }

</bundles_post_ra>
